<compile_context>
chip_gen: v6e
topology: v6e:2x2x1
jax: 0.10.0
libtpu: 0.0.40
codegen_flags: <defaults>
</compile_context>

<pallas_src>
import functools

import jax
import jax.numpy as jnp
import numpy as np
from jax.experimental import pallas as pl
from jax.experimental.pallas import tpu as pltpu

D_MODEL = 32
N_HEAD = 4
SEQ = 8
BATCH = 2
NCTX = 4          # design_details['learnabel_text_embedding_length']
LN_EPS = 1e-5


# ----------------------------------------------------------------------------
# Fused transformer-block kernel: whole [L*B, D] slab in one invocation
# ----------------------------------------------------------------------------
def _block_kernel(num_heads, batch,
                  x_ref,                       # (N, D), N = L*B, rows ordered (l, b)
                  g1_ref, b1_ref,              # (1, D)            -- ln_1
                  win_ref, bin_ref,            # (D, 3D), (1, 3D)  -- attn.in_proj (pre-T, q pre-scaled)
                  wout_ref, bout_ref,          # (D, D), (1, D)    -- attn.out_proj (pre-T)
                  g2_ref, b2_ref,              # (1, D)            -- ln_2
                  wfc_ref, bfc_ref,            # (D, 4D), (1, 4D)  -- mlp.c_fc (pre-T)
                  wpr_ref, bpr_ref,            # (4D, D), (1, D)   -- mlp.c_proj (pre-T)
                  o_ref):                      # (N, D)
    x = x_ref[...].astype(jnp.float32)         # [N, D]
    N, D = x.shape
    dh = D // num_heads

    # --- LayerNorm 1 (fp32, matching the fp16-safe LayerNorm subclass) ---
    mu = jnp.mean(x, axis=-1, keepdims=True)
    var = jnp.mean(jnp.square(x - mu), axis=-1, keepdims=True)
    x_ln1 = (x - mu) * jax.lax.rsqrt(var + LN_EPS) * g1_ref[...] + b1_ref[...]

    # --- QKV projection (q already carries the 1/sqrt(dh) scale, folded at prep) ---
    qkv = jnp.dot(x_ln1, win_ref[...],
                  preferred_element_type=jnp.float32) + bin_ref[...]   # [N, 3D]
    q = qkv[:, 0:D]
    k = qkv[:, D:2 * D]
    v = qkv[:, 2 * D:3 * D]

    # Same-batch mask: row r = l*B + b  ->  batch index r % B.  Queries may only
    # attend to keys of the same batch element (block structure over b).
    rows = jax.lax.broadcasted_iota(jnp.int32, (N, N), 0)
    cols = jax.lax.broadcasted_iota(jnp.int32, (N, N), 1)
    same_b = (rows % batch) == (cols % batch)
    neg_big = jnp.float32(-1e30)

    # --- Multi-head self attention (short static loop over heads) ---
    head_outs = []
    for h in range(num_heads):
        sl = slice(h * dh, (h + 1) * dh)
        # q_h @ k_h^T expressed via contracting dims (no explicit relayout of k)
        s = jax.lax.dot_general(q[:, sl], k[:, sl],
                                dimension_numbers=(((1,), (1,)), ((), ())),
                                preferred_element_type=jnp.float32)    # [N, N]
        s = jnp.where(same_b, s, neg_big)
        s = s - jnp.max(s, axis=-1, keepdims=True)
        p = jnp.exp(s)                                                  # masked -> 0
        p = p * pl.reciprocal(jnp.sum(p, axis=-1, keepdims=True), approx=True)
        head_outs.append(jnp.dot(p, v[:, sl], preferred_element_type=jnp.float32))
    attn = jnp.concatenate(head_outs, axis=-1)                          # [N, D]
    attn = jnp.dot(attn, wout_ref[...],
                   preferred_element_type=jnp.float32) + bout_ref[...]

    x1 = x + attn                                                       # residual 1

    # --- LayerNorm 2 + MLP (c_fc -> QuickGELU -> c_proj) ---
    mu2 = jnp.mean(x1, axis=-1, keepdims=True)
    var2 = jnp.mean(jnp.square(x1 - mu2), axis=-1, keepdims=True)
    x_ln2 = (x1 - mu2) * jax.lax.rsqrt(var2 + LN_EPS) * g2_ref[...] + b2_ref[...]

    hdn = jnp.dot(x_ln2, wfc_ref[...],
                  preferred_element_type=jnp.float32) + bfc_ref[...]    # [N, 4D]
    hdn = hdn * jax.nn.sigmoid(1.702 * hdn)                             # QuickGELU
    mlp = jnp.dot(hdn, wpr_ref[...],
                  preferred_element_type=jnp.float32) + bpr_ref[...]    # [N, D]

    o_ref[...] = (x1 + mlp).astype(o_ref.dtype)                         # residual 2


def _run_block_kernel(x_2d, kp, num_heads, batch):
    """x_2d: [L*B, D] (rows ordered (l, b)). Returns [L*B, D]."""
    N, D = x_2d.shape
    kernel = functools.partial(_block_kernel, num_heads, batch)

    weights = (kp["g1"], kp["b1"], kp["w_in_t"], kp["b_in"],
               kp["w_out_t"], kp["b_out"], kp["g2"], kp["b2"],
               kp["w_fc_t"], kp["b_fc"], kp["w_proj_t"], kp["b_proj"])

    def full_spec(a):
        return pl.BlockSpec(a.shape, lambda i: (0,) * a.ndim)

    return pl.pallas_call(
        kernel,
        out_shape=jax.ShapeDtypeStruct((N, D), x_2d.dtype),
        grid=(1,),                                  # collapsed: one fused step
        in_specs=[full_spec(x_2d)] + [full_spec(w) for w in weights],
        out_specs=full_spec(x_2d),
        compiler_params=pltpu.CompilerParams(
            dimension_semantics=("arbitrary",)),
    )(x_2d, *weights)


# ----------------------------------------------------------------------------
# Parameter prep: transpose weights once, fold the q scale into the in-proj
# ----------------------------------------------------------------------------
def prepare_kernel_params(p, num_heads=N_HEAD):
    d = p["g1"].shape[-1]
    dh = d // num_heads
    scale = float(dh) ** -0.5                 # torch MultiheadAttention q scaling
    col_scale = jnp.concatenate([jnp.full((d,), scale, jnp.float32),
                                 jnp.ones((2 * d,), jnp.float32)])
    w_in_t = jnp.transpose(p["w_in"]) * col_scale[None, :]     # (D, 3D)
    b_in = p["b_in"] * col_scale[None, :]                      # (1, 3D)
    return {
        "g1": p["g1"], "b1": p["b1"],
        "w_in_t": w_in_t, "b_in": b_in,
        "w_out_t": jnp.transpose(p["w_out"]), "b_out": p["b_out"],
        "g2": p["g2"], "b2": p["b2"],
        "w_fc_t": jnp.transpose(p["w_fc"]), "b_fc": p["b_fc"],
        "w_proj_t": jnp.transpose(p["w_proj"]), "b_proj": p["b_proj"],
    }


# ----------------------------------------------------------------------------
# Module-level forward (MaPLe prompt injection is shape glue -> plain JAX)
# ----------------------------------------------------------------------------
def residual_attention_block_maple(x, kernel_params, compound_prompts_deeper, counter,
                                   *, first_layer=False,
                                   compound_prompt_nctx=NCTX, num_heads=N_HEAD):
    """x: [L, B, D] (torch MultiheadAttention layout). Returns ([L', B, D], prompts, counter)."""
    if (not first_layer) and len(compound_prompts_deeper) > 0 \
            and counter <= len(compound_prompts_deeper) - 1:
        if counter == 0:
            prefix = x
        else:
            prefix = x[0:x.shape[0] - compound_prompt_nctx, :, :]
        visual_context = compound_prompts_deeper[counter]          # [nctx, D]
        bs = x.shape[1]
        visual_context = jnp.broadcast_to(
            visual_context[None, :, :], (bs,) + visual_context.shape)
        visual_context = jnp.transpose(visual_context, (1, 0, 2))  # [nctx, B, D]
        # mimic torch `.half()` then cast back for the fp32 pipeline
        visual_context = visual_context.astype(jnp.float16).astype(x.dtype)
        x = jnp.concatenate([prefix, visual_context], axis=0)
        counter += 1

    L, B, D = x.shape
    x_2d = jnp.reshape(x, (L * B, D))           # free row-major flatten, no transpose
    out_2d = _run_block_kernel(x_2d, kernel_params, num_heads, B)
    return jnp.reshape(out_2d, (L, B, D)), compound_prompts_deeper, counter


# ----------------------------------------------------------------------------
# Deterministic parameter init (torch-layout shapes from the module __init__)
# ----------------------------------------------------------------------------
def init_params(key, d=D_MODEL):
    ks = jax.random.split(key, 8)
    s = 0.05
    return {
        "g1": jnp.ones((1, d), jnp.float32),
        "b1": jnp.zeros((1, d), jnp.float32),
        "w_in": s * jax.random.normal(ks[0], (3 * d, d), jnp.float32),
        "b_in": s * jax.random.normal(ks[1], (1, 3 * d), jnp.float32),
        "w_out": s * jax.random.normal(ks[2], (d, d), jnp.float32),
        "b_out": s * jax.random.normal(ks[3], (1, d), jnp.float32),
        "g2": jnp.ones((1, d), jnp.float32),
        "b2": jnp.zeros((1, d), jnp.float32),
        "w_fc": s * jax.random.normal(ks[4], (4 * d, d), jnp.float32),
        "b_fc": s * jax.random.normal(ks[5], (1, 4 * d), jnp.float32),
        "w_proj": s * jax.random.normal(ks[6], (d, 4 * d), jnp.float32),
        "b_proj": s * jax.random.normal(ks[7], (1, d), jnp.float32),
    }


# ----------------------------------------------------------------------------
# Pure-JAX reference (mirrors the PyTorch math, torch-layout params)
# ----------------------------------------------------------------------------
def _reference(x, p, prompts, counter):
    vc = jnp.broadcast_to(prompts[counter][None], (x.shape[1],) + prompts[counter].shape)
    vc = jnp.transpose(vc, (1, 0, 2)).astype(jnp.float16).astype(x.dtype)
    x = jnp.concatenate([x, vc], axis=0)                 # [L', B, D]
    x = jnp.transpose(x, (1, 0, 2))                      # [B, L', D]

    def ln(y, g, b):
        mu = jnp.mean(y, -1, keepdims=True)
        var = jnp.mean(jnp.square(y - mu), -1, keepdims=True)
        return (y - mu) * jax.lax.rsqrt(var + LN_EPS) * g + b

    def attn(y):
        qkv = y @ p["w_in"].T + p["b_in"]
        q, k, v = jnp.split(qkv, 3, axis=-1)
        B, L, D = q.shape
        dh = D // N_HEAD
        q = q.reshape(B, L, N_HEAD, dh).transpose(0, 2, 1, 3) * (dh ** -0.5)
        k = k.reshape(B, L, N_HEAD, dh).transpose(0, 2, 1, 3)
        v = v.reshape(B, L, N_HEAD, dh).transpose(0, 2, 1, 3)
        s = jnp.einsum("bhqd,bhkd->bhqk", q, k)
        pr = jax.nn.softmax(s, axis=-1)
        o = jnp.einsum("bhqk,bhkd->bhqd", pr, v).transpose(0, 2, 1, 3).reshape(B, L, D)
        return o @ p["w_out"].T + p["b_out"]

    x = x + attn(ln(x, p["g1"], p["b1"]))
    h = ln(x, p["g2"], p["b2"]) @ p["w_fc"].T + p["b_fc"]
    h = h * jax.nn.sigmoid(1.702 * h)
    x = x + (h @ p["w_proj"].T + p["b_proj"])
    return jnp.transpose(x, (1, 0, 2))                   # back to [L', B, D]


if __name__ == "__main__":
    key = jax.random.PRNGKey(0)
    k_x, k_p, k_w = jax.random.split(key, 3)

    # inputs = [x, compound_prompts_deeper, counter]  (non-first layer, counter == 0)
    x = jax.random.normal(k_x, (SEQ, BATCH, D_MODEL), jnp.float32)
    compound_prompts_deeper = [jax.random.normal(k_p, (NCTX, D_MODEL), jnp.float32)]
    counter = 0

    params = init_params(k_w)
    kernel_params = prepare_kernel_params(params, N_HEAD)   # one-time transform

    out, prompts_out, counter_out = residual_attention_block_maple(
        x, kernel_params, compound_prompts_deeper, counter,
        first_layer=False, compound_prompt_nctx=NCTX)
    out = jax.block_until_ready(out)

    assert out.shape == (SEQ + NCTX, BATCH, D_MODEL)
    assert counter_out == 1

    ref = jax.block_until_ready(_reference(x, params, compound_prompts_deeper, 0))
    np.testing.assert_allclose(np.asarray(out), np.asarray(ref), atol=5e-2, rtol=5e-2)

    print("KERNEL_OK")
</pallas_src>

<mosaic_0001>
module attributes {stable_mosaic.version = 11 : i64} {
  func.func @_block_kernel(%arg0: i32, %arg1: memref<24x32xf32, #tpu.memory_space<vmem>>, %arg2: memref<1x32xf32, #tpu.memory_space<vmem>>, %arg3: memref<1x32xf32, #tpu.memory_space<vmem>>, %arg4: memref<32x96xf32, #tpu.memory_space<vmem>>, %arg5: memref<1x96xf32, #tpu.memory_space<vmem>>, %arg6: memref<32x32xf32, #tpu.memory_space<vmem>>, %arg7: memref<1x32xf32, #tpu.memory_space<vmem>>, %arg8: memref<1x32xf32, #tpu.memory_space<vmem>>, %arg9: memref<1x32xf32, #tpu.memory_space<vmem>>, %arg10: memref<32x128xf32, #tpu.memory_space<vmem>>, %arg11: memref<1x128xf32, #tpu.memory_space<vmem>>, %arg12: memref<128x32xf32, #tpu.memory_space<vmem>>, %arg13: memref<1x32xf32, #tpu.memory_space<vmem>>, %arg14: memref<24x32xf32, #tpu.memory_space<vmem>>) attributes {dimension_semantics = [#tpu.dimension_semantics<arbitrary>], iteration_bounds = array<i64: 1>, scalar_prefetch = 0 : i64, scratch_operands = 0 : i64, tpu.core_type = #tpu.core_type<tc>, window_params = [{pipeline_mode = #tpu.pipeline_mode<synchronous>, transform_indices = @transform_0, window_bounds = array<i64: 24, 32>}, {pipeline_mode = #tpu.pipeline_mode<synchronous>, transform_indices = @transform_1, window_bounds = array<i64: 1, 32>}, {pipeline_mode = #tpu.pipeline_mode<synchronous>, transform_indices = @transform_2, window_bounds = array<i64: 1, 32>}, {pipeline_mode = #tpu.pipeline_mode<synchronous>, transform_indices = @transform_3, window_bounds = array<i64: 32, 96>}, {pipeline_mode = #tpu.pipeline_mode<synchronous>, transform_indices = @transform_4, window_bounds = array<i64: 1, 96>}, {pipeline_mode = #tpu.pipeline_mode<synchronous>, transform_indices = @transform_5, window_bounds = array<i64: 32, 32>}, {pipeline_mode = #tpu.pipeline_mode<synchronous>, transform_indices = @transform_6, window_bounds = array<i64: 1, 32>}, {pipeline_mode = #tpu.pipeline_mode<synchronous>, transform_indices = @transform_7, window_bounds = array<i64: 1, 32>}, {pipeline_mode = #tpu.pipeline_mode<synchronous>, transform_indices = @transform_8, window_bounds = array<i64: 1, 32>}, {pipeline_mode = #tpu.pipeline_mode<synchronous>, transform_indices = @transform_9, window_bounds = array<i64: 32, 128>}, {pipeline_mode = #tpu.pipeline_mode<synchronous>, transform_indices = @transform_10, window_bounds = array<i64: 1, 128>}, {pipeline_mode = #tpu.pipeline_mode<synchronous>, transform_indices = @transform_11, window_bounds = array<i64: 128, 32>}, {pipeline_mode = #tpu.pipeline_mode<synchronous>, transform_indices = @transform_12, window_bounds = array<i64: 1, 32>}, {pipeline_mode = #tpu.pipeline_mode<synchronous>, transform_indices = @transform_13, window_bounds = array<i64: 24, 32>}]} {
    %c0 = arith.constant 0 : index
    %c0_0 = arith.constant 0 : index
    %0 = vector.load %arg1[%c0, %c0_0] : memref<24x32xf32, #tpu.memory_space<vmem>>, vector<24x32xf32>
    %cst = arith.constant dense<0.000000e+00> : vector<24xf32>
    %1 = vector.multi_reduction <add>, %0, %cst [1] : vector<24x32xf32> to vector<24xf32>
    %2 = vector.shape_cast %1 : vector<24xf32> to vector<24x1xf32>
    %cst_1 = arith.constant 3.200000e+01 : f32
    %3 = vector.broadcast %cst_1 : f32 to vector<24x1xf32>
    %4 = arith.divf %2, %3 : vector<24x1xf32>
    %5 = vector.broadcast %4 : vector<24x1xf32> to vector<24x32xf32>
    %6 = arith.subf %0, %5 : vector<24x32xf32>
    %7 = arith.mulf %6, %6 : vector<24x32xf32>
    %cst_2 = arith.constant dense<0.000000e+00> : vector<24xf32>
    %8 = vector.multi_reduction <add>, %7, %cst_2 [1] : vector<24x32xf32> to vector<24xf32>
    %9 = vector.shape_cast %8 : vector<24xf32> to vector<24x1xf32>
    %cst_3 = arith.constant 3.200000e+01 : f32
    %10 = vector.broadcast %cst_3 : f32 to vector<24x1xf32>
    %11 = arith.divf %9, %10 : vector<24x1xf32>
    %12 = vector.broadcast %4 : vector<24x1xf32> to vector<24x32xf32>
    %13 = arith.subf %0, %12 : vector<24x32xf32>
    %cst_4 = arith.constant 9.99999974E-6 : f32
    %14 = vector.broadcast %cst_4 : f32 to vector<24x1xf32>
    %15 = arith.addf %11, %14 : vector<24x1xf32>
    %16 = math.rsqrt %15 : vector<24x1xf32>
    %17 = vector.broadcast %16 : vector<24x1xf32> to vector<24x32xf32>
    %18 = arith.mulf %13, %17 : vector<24x32xf32>
    %c0_5 = arith.constant 0 : index
    %c0_6 = arith.constant 0 : index
    %19 = vector.load %arg2[%c0_5, %c0_6] : memref<1x32xf32, #tpu.memory_space<vmem>>, vector<1x32xf32>
    %20 = vector.broadcast %19 : vector<1x32xf32> to vector<24x32xf32>
    %21 = arith.mulf %18, %20 : vector<24x32xf32>
    %c0_7 = arith.constant 0 : index
    %c0_8 = arith.constant 0 : index
    %22 = vector.load %arg3[%c0_7, %c0_8] : memref<1x32xf32, #tpu.memory_space<vmem>>, vector<1x32xf32>
    %23 = vector.broadcast %22 : vector<1x32xf32> to vector<24x32xf32>
    %24 = arith.addf %21, %23 : vector<24x32xf32>
    %c0_9 = arith.constant 0 : index
    %c0_10 = arith.constant 0 : index
    %25 = vector.load %arg4[%c0_9, %c0_10] : memref<32x96xf32, #tpu.memory_space<vmem>>, vector<32x96xf32>
    %cst_11 = arith.constant dense<0.000000e+00> : vector<24x96xf32>
    %26 = tpu.matmul %24, %25, %cst_11 {dimension_numbers = #tpu.dot_dimension_numbers<[1], [0], [0], [1], [0, 0, 1, 1], [], []>} : vector<24x32xf32>, vector<32x96xf32>, vector<24x96xf32> -> vector<24x96xf32>
    %c0_12 = arith.constant 0 : index
    %c0_13 = arith.constant 0 : index
    %27 = vector.load %arg5[%c0_12, %c0_13] : memref<1x96xf32, #tpu.memory_space<vmem>>, vector<1x96xf32>
    %28 = vector.broadcast %27 : vector<1x96xf32> to vector<24x96xf32>
    %29 = arith.addf %26, %28 : vector<24x96xf32>
    %30 = vector.extract_strided_slice %29 {offsets = [0, 0], sizes = [24, 32], strides = [1, 1]} : vector<24x96xf32> to vector<24x32xf32>
    %31 = vector.extract_strided_slice %29 {offsets = [0, 32], sizes = [24, 32], strides = [1, 1]} : vector<24x96xf32> to vector<24x32xf32>
    %32 = vector.extract_strided_slice %29 {offsets = [0, 64], sizes = [24, 32], strides = [1, 1]} : vector<24x96xf32> to vector<24x32xf32>
    %33 = tpu.iota {dimensions = array<i32: 0>} : vector<24x24xi32>
    %34 = tpu.iota {dimensions = array<i32: 1>} : vector<24x24xi32>
    %c2_i32 = arith.constant 2 : i32
    %c0_i32 = arith.constant 0 : i32
    %35 = arith.cmpi eq, %c2_i32, %c0_i32 : i32
    %c1_i32 = arith.constant 1 : i32
    %36 = arith.select %35, %c1_i32, %c2_i32 : i32
    %37 = vector.broadcast %36 : i32 to vector<24x24xi32>
    %38 = arith.remsi %33, %37 : vector<24x24xi32>
    %c0_i32_14 = arith.constant 0 : i32
    %39 = vector.broadcast %c0_i32_14 : i32 to vector<24x24xi32>
    %40 = arith.cmpi ne, %38, %39 : vector<24x24xi32>
    %c0_i32_15 = arith.constant 0 : i32
    %41 = vector.broadcast %c0_i32_15 : i32 to vector<24x24xi32>
    %42 = arith.cmpi slt, %38, %41 : vector<24x24xi32>
    %c0_i32_16 = arith.constant 0 : i32
    %43 = arith.cmpi slt, %36, %c0_i32_16 : i32
    %44 = vector.broadcast %43 : i1 to vector<24x24xi1>
    %45 = vector.broadcast %44 : vector<24x24xi1> to vector<24x24xi1>
    %46 = arith.xori %42, %45 : vector<24x24xi1>
    %47 = arith.andi %46, %40 : vector<24x24xi1>
    %48 = vector.broadcast %36 : i32 to vector<24x24xi32>
    %49 = arith.addi %38, %48 : vector<24x24xi32>
    %50 = arith.select %47, %49, %38 : vector<24x24xi1>, vector<24x24xi32>
    %c2_i32_17 = arith.constant 2 : i32
    %c0_i32_18 = arith.constant 0 : i32
    %51 = arith.cmpi eq, %c2_i32_17, %c0_i32_18 : i32
    %c1_i32_19 = arith.constant 1 : i32
    %52 = arith.select %51, %c1_i32_19, %c2_i32_17 : i32
    %53 = vector.broadcast %52 : i32 to vector<24x24xi32>
    %54 = arith.remsi %34, %53 : vector<24x24xi32>
    %c0_i32_20 = arith.constant 0 : i32
    %55 = vector.broadcast %c0_i32_20 : i32 to vector<24x24xi32>
    %56 = arith.cmpi ne, %54, %55 : vector<24x24xi32>
    %c0_i32_21 = arith.constant 0 : i32
    %57 = vector.broadcast %c0_i32_21 : i32 to vector<24x24xi32>
    %58 = arith.cmpi slt, %54, %57 : vector<24x24xi32>
    %c0_i32_22 = arith.constant 0 : i32
    %59 = arith.cmpi slt, %52, %c0_i32_22 : i32
    %60 = vector.broadcast %59 : i1 to vector<24x24xi1>
    %61 = vector.broadcast %60 : vector<24x24xi1> to vector<24x24xi1>
    %62 = arith.xori %58, %61 : vector<24x24xi1>
    %63 = arith.andi %62, %56 : vector<24x24xi1>
    %64 = vector.broadcast %52 : i32 to vector<24x24xi32>
    %65 = arith.addi %54, %64 : vector<24x24xi32>
    %66 = arith.select %63, %65, %54 : vector<24x24xi1>, vector<24x24xi32>
    %67 = arith.cmpi eq, %50, %66 : vector<24x24xi32>
    %68 = vector.extract_strided_slice %30 {offsets = [0, 0], sizes = [24, 8], strides = [1, 1]} : vector<24x32xf32> to vector<24x8xf32>
    %69 = vector.extract_strided_slice %31 {offsets = [0, 0], sizes = [24, 8], strides = [1, 1]} : vector<24x32xf32> to vector<24x8xf32>
    %cst_23 = arith.constant dense<0.000000e+00> : vector<24x24xf32>
    %70 = tpu.matmul %68, %69, %cst_23 {dimension_numbers = #tpu.dot_dimension_numbers<[1], [1], [0], [0], [0, 0, 1, 0], [], []>} : vector<24x8xf32>, vector<24x8xf32>, vector<24x24xf32> -> vector<24x24xf32>
    %cst_24 = arith.constant -1.000000e+30 : f32
    %71 = vector.broadcast %cst_24 : f32 to vector<24x24xf32>
    %72 = arith.select %67, %70, %71 : vector<24x24xi1>, vector<24x24xf32>
    %cst_25 = arith.constant dense<0xFF800000> : vector<24xf32>
    %73 = vector.multi_reduction <maximumf>, %72, %cst_25 [1] : vector<24x24xf32> to vector<24xf32>
    %74 = vector.shape_cast %73 : vector<24xf32> to vector<24x1xf32>
    %75 = vector.broadcast %74 : vector<24x1xf32> to vector<24x24xf32>
    %76 = arith.subf %72, %75 : vector<24x24xf32>
    %77 = math.exp %76 : vector<24x24xf32>
    %cst_26 = arith.constant dense<0.000000e+00> : vector<24xf32>
    %78 = vector.multi_reduction <add>, %77, %cst_26 [1] : vector<24x24xf32> to vector<24xf32>
    %79 = vector.shape_cast %78 : vector<24xf32> to vector<24x1xf32>
    %80 = tpu.reciprocal %79 {approx = true} : vector<24x1xf32> -> vector<24x1xf32>
    %81 = vector.broadcast %80 : vector<24x1xf32> to vector<24x24xf32>
    %82 = arith.mulf %77, %81 : vector<24x24xf32>
    %83 = vector.extract_strided_slice %32 {offsets = [0, 0], sizes = [24, 8], strides = [1, 1]} : vector<24x32xf32> to vector<24x8xf32>
    %cst_27 = arith.constant dense<0.000000e+00> : vector<24x8xf32>
    %84 = tpu.matmul %82, %83, %cst_27 {dimension_numbers = #tpu.dot_dimension_numbers<[1], [0], [0], [1], [0, 0, 1, 1], [], []>} : vector<24x24xf32>, vector<24x8xf32>, vector<24x8xf32> -> vector<24x8xf32>
    %85 = vector.extract_strided_slice %30 {offsets = [0, 8], sizes = [24, 8], strides = [1, 1]} : vector<24x32xf32> to vector<24x8xf32>
    %86 = vector.extract_strided_slice %31 {offsets = [0, 8], sizes = [24, 8], strides = [1, 1]} : vector<24x32xf32> to vector<24x8xf32>
    %cst_28 = arith.constant dense<0.000000e+00> : vector<24x24xf32>
    %87 = tpu.matmul %85, %86, %cst_28 {dimension_numbers = #tpu.dot_dimension_numbers<[1], [1], [0], [0], [0, 0, 1, 0], [], []>} : vector<24x8xf32>, vector<24x8xf32>, vector<24x24xf32> -> vector<24x24xf32>
    %cst_29 = arith.constant -1.000000e+30 : f32
    %88 = vector.broadcast %cst_29 : f32 to vector<24x24xf32>
    %89 = arith.select %67, %87, %88 : vector<24x24xi1>, vector<24x24xf32>
    %cst_30 = arith.constant dense<0xFF800000> : vector<24xf32>
    %90 = vector.multi_reduction <maximumf>, %89, %cst_30 [1] : vector<24x24xf32> to vector<24xf32>
    %91 = vector.shape_cast %90 : vector<24xf32> to vector<24x1xf32>
    %92 = vector.broadcast %91 : vector<24x1xf32> to vector<24x24xf32>
    %93 = arith.subf %89, %92 : vector<24x24xf32>
    %94 = math.exp %93 : vector<24x24xf32>
    %cst_31 = arith.constant dense<0.000000e+00> : vector<24xf32>
    %95 = vector.multi_reduction <add>, %94, %cst_31 [1] : vector<24x24xf32> to vector<24xf32>
    %96 = vector.shape_cast %95 : vector<24xf32> to vector<24x1xf32>
    %97 = tpu.reciprocal %96 {approx = true} : vector<24x1xf32> -> vector<24x1xf32>
    %98 = vector.broadcast %97 : vector<24x1xf32> to vector<24x24xf32>
    %99 = arith.mulf %94, %98 : vector<24x24xf32>
    %100 = vector.extract_strided_slice %32 {offsets = [0, 8], sizes = [24, 8], strides = [1, 1]} : vector<24x32xf32> to vector<24x8xf32>
    %cst_32 = arith.constant dense<0.000000e+00> : vector<24x8xf32>
    %101 = tpu.matmul %99, %100, %cst_32 {dimension_numbers = #tpu.dot_dimension_numbers<[1], [0], [0], [1], [0, 0, 1, 1], [], []>} : vector<24x24xf32>, vector<24x8xf32>, vector<24x8xf32> -> vector<24x8xf32>
    %102 = vector.extract_strided_slice %30 {offsets = [0, 16], sizes = [24, 8], strides = [1, 1]} : vector<24x32xf32> to vector<24x8xf32>
    %103 = vector.extract_strided_slice %31 {offsets = [0, 16], sizes = [24, 8], strides = [1, 1]} : vector<24x32xf32> to vector<24x8xf32>
    %cst_33 = arith.constant dense<0.000000e+00> : vector<24x24xf32>
    %104 = tpu.matmul %102, %103, %cst_33 {dimension_numbers = #tpu.dot_dimension_numbers<[1], [1], [0], [0], [0, 0, 1, 0], [], []>} : vector<24x8xf32>, vector<24x8xf32>, vector<24x24xf32> -> vector<24x24xf32>
    %cst_34 = arith.constant -1.000000e+30 : f32
    %105 = vector.broadcast %cst_34 : f32 to vector<24x24xf32>
    %106 = arith.select %67, %104, %105 : vector<24x24xi1>, vector<24x24xf32>
    %cst_35 = arith.constant dense<0xFF800000> : vector<24xf32>
    %107 = vector.multi_reduction <maximumf>, %106, %cst_35 [1] : vector<24x24xf32> to vector<24xf32>
    %108 = vector.shape_cast %107 : vector<24xf32> to vector<24x1xf32>
    %109 = vector.broadcast %108 : vector<24x1xf32> to vector<24x24xf32>
    %110 = arith.subf %106, %109 : vector<24x24xf32>
    %111 = math.exp %110 : vector<24x24xf32>
    %cst_36 = arith.constant dense<0.000000e+00> : vector<24xf32>
    %112 = vector.multi_reduction <add>, %111, %cst_36 [1] : vector<24x24xf32> to vector<24xf32>
    %113 = vector.shape_cast %112 : vector<24xf32> to vector<24x1xf32>
    %114 = tpu.reciprocal %113 {approx = true} : vector<24x1xf32> -> vector<24x1xf32>
    %115 = vector.broadcast %114 : vector<24x1xf32> to vector<24x24xf32>
    %116 = arith.mulf %111, %115 : vector<24x24xf32>
    %117 = vector.extract_strided_slice %32 {offsets = [0, 16], sizes = [24, 8], strides = [1, 1]} : vector<24x32xf32> to vector<24x8xf32>
    %cst_37 = arith.constant dense<0.000000e+00> : vector<24x8xf32>
    %118 = tpu.matmul %116, %117, %cst_37 {dimension_numbers = #tpu.dot_dimension_numbers<[1], [0], [0], [1], [0, 0, 1, 1], [], []>} : vector<24x24xf32>, vector<24x8xf32>, vector<24x8xf32> -> vector<24x8xf32>
    %119 = vector.extract_strided_slice %30 {offsets = [0, 24], sizes = [24, 8], strides = [1, 1]} : vector<24x32xf32> to vector<24x8xf32>
    %120 = vector.extract_strided_slice %31 {offsets = [0, 24], sizes = [24, 8], strides = [1, 1]} : vector<24x32xf32> to vector<24x8xf32>
    %cst_38 = arith.constant dense<0.000000e+00> : vector<24x24xf32>
    %121 = tpu.matmul %119, %120, %cst_38 {dimension_numbers = #tpu.dot_dimension_numbers<[1], [1], [0], [0], [0, 0, 1, 0], [], []>} : vector<24x8xf32>, vector<24x8xf32>, vector<24x24xf32> -> vector<24x24xf32>
    %cst_39 = arith.constant -1.000000e+30 : f32
    %122 = vector.broadcast %cst_39 : f32 to vector<24x24xf32>
    %123 = arith.select %67, %121, %122 : vector<24x24xi1>, vector<24x24xf32>
    %cst_40 = arith.constant dense<0xFF800000> : vector<24xf32>
    %124 = vector.multi_reduction <maximumf>, %123, %cst_40 [1] : vector<24x24xf32> to vector<24xf32>
    %125 = vector.shape_cast %124 : vector<24xf32> to vector<24x1xf32>
    %126 = vector.broadcast %125 : vector<24x1xf32> to vector<24x24xf32>
    %127 = arith.subf %123, %126 : vector<24x24xf32>
    %128 = math.exp %127 : vector<24x24xf32>
    %cst_41 = arith.constant dense<0.000000e+00> : vector<24xf32>
    %129 = vector.multi_reduction <add>, %128, %cst_41 [1] : vector<24x24xf32> to vector<24xf32>
    %130 = vector.shape_cast %129 : vector<24xf32> to vector<24x1xf32>
    %131 = tpu.reciprocal %130 {approx = true} : vector<24x1xf32> -> vector<24x1xf32>
    %132 = vector.broadcast %131 : vector<24x1xf32> to vector<24x24xf32>
    %133 = arith.mulf %128, %132 : vector<24x24xf32>
    %134 = vector.extract_strided_slice %32 {offsets = [0, 24], sizes = [24, 8], strides = [1, 1]} : vector<24x32xf32> to vector<24x8xf32>
    %cst_42 = arith.constant dense<0.000000e+00> : vector<24x8xf32>
    %135 = tpu.matmul %133, %134, %cst_42 {dimension_numbers = #tpu.dot_dimension_numbers<[1], [0], [0], [1], [0, 0, 1, 1], [], []>} : vector<24x24xf32>, vector<24x8xf32>, vector<24x8xf32> -> vector<24x8xf32>
    %136 = tpu.concatenate %84, %101, %118, %135 in 1 : vector<24x8xf32>, vector<24x8xf32>, vector<24x8xf32>, vector<24x8xf32> -> vector<24x32xf32>
    %c0_43 = arith.constant 0 : index
    %c0_44 = arith.constant 0 : index
    %137 = vector.load %arg6[%c0_43, %c0_44] : memref<32x32xf32, #tpu.memory_space<vmem>>, vector<32x32xf32>
    %cst_45 = arith.constant dense<0.000000e+00> : vector<24x32xf32>
    %138 = tpu.matmul %136, %137, %cst_45 {dimension_numbers = #tpu.dot_dimension_numbers<[1], [0], [0], [1], [0, 0, 1, 1], [], []>} : vector<24x32xf32>, vector<32x32xf32>, vector<24x32xf32> -> vector<24x32xf32>
    %c0_46 = arith.constant 0 : index
    %c0_47 = arith.constant 0 : index
    %139 = vector.load %arg7[%c0_46, %c0_47] : memref<1x32xf32, #tpu.memory_space<vmem>>, vector<1x32xf32>
    %140 = vector.broadcast %139 : vector<1x32xf32> to vector<24x32xf32>
    %141 = arith.addf %138, %140 : vector<24x32xf32>
    %142 = arith.addf %0, %141 : vector<24x32xf32>
    %cst_48 = arith.constant dense<0.000000e+00> : vector<24xf32>
    %143 = vector.multi_reduction <add>, %142, %cst_48 [1] : vector<24x32xf32> to vector<24xf32>
    %144 = vector.shape_cast %143 : vector<24xf32> to vector<24x1xf32>
    %cst_49 = arith.constant 3.200000e+01 : f32
    %145 = vector.broadcast %cst_49 : f32 to vector<24x1xf32>
    %146 = arith.divf %144, %145 : vector<24x1xf32>
    %147 = vector.broadcast %146 : vector<24x1xf32> to vector<24x32xf32>
    %148 = arith.subf %142, %147 : vector<24x32xf32>
    %149 = arith.mulf %148, %148 : vector<24x32xf32>
    %cst_50 = arith.constant dense<0.000000e+00> : vector<24xf32>
    %150 = vector.multi_reduction <add>, %149, %cst_50 [1] : vector<24x32xf32> to vector<24xf32>
    %151 = vector.shape_cast %150 : vector<24xf32> to vector<24x1xf32>
    %cst_51 = arith.constant 3.200000e+01 : f32
    %152 = vector.broadcast %cst_51 : f32 to vector<24x1xf32>
    %153 = arith.divf %151, %152 : vector<24x1xf32>
    %154 = vector.broadcast %146 : vector<24x1xf32> to vector<24x32xf32>
    %155 = arith.subf %142, %154 : vector<24x32xf32>
    %cst_52 = arith.constant 9.99999974E-6 : f32
    %156 = vector.broadcast %cst_52 : f32 to vector<24x1xf32>
    %157 = arith.addf %153, %156 : vector<24x1xf32>
    %158 = math.rsqrt %157 : vector<24x1xf32>
    %159 = vector.broadcast %158 : vector<24x1xf32> to vector<24x32xf32>
    %160 = arith.mulf %155, %159 : vector<24x32xf32>
    %c0_53 = arith.constant 0 : index
    %c0_54 = arith.constant 0 : index
    %161 = vector.load %arg8[%c0_53, %c0_54] : memref<1x32xf32, #tpu.memory_space<vmem>>, vector<1x32xf32>
    %162 = vector.broadcast %161 : vector<1x32xf32> to vector<24x32xf32>
    %163 = arith.mulf %160, %162 : vector<24x32xf32>
    %c0_55 = arith.constant 0 : index
    %c0_56 = arith.constant 0 : index
    %164 = vector.load %arg9[%c0_55, %c0_56] : memref<1x32xf32, #tpu.memory_space<vmem>>, vector<1x32xf32>
    %165 = vector.broadcast %164 : vector<1x32xf32> to vector<24x32xf32>
    %166 = arith.addf %163, %165 : vector<24x32xf32>
    %c0_57 = arith.constant 0 : index
    %c0_58 = arith.constant 0 : index
    %167 = vector.load %arg10[%c0_57, %c0_58] : memref<32x128xf32, #tpu.memory_space<vmem>>, vector<32x128xf32>
    %cst_59 = arith.constant dense<0.000000e+00> : vector<24x128xf32>
    %168 = tpu.matmul %166, %167, %cst_59 {dimension_numbers = #tpu.dot_dimension_numbers<[1], [0], [0], [1], [0, 0, 1, 1], [], []>} : vector<24x32xf32>, vector<32x128xf32>, vector<24x128xf32> -> vector<24x128xf32>
    %c0_60 = arith.constant 0 : index
    %c0_61 = arith.constant 0 : index
    %169 = vector.load %arg11[%c0_60, %c0_61] : memref<1x128xf32, #tpu.memory_space<vmem>>, vector<1x128xf32>
    %170 = vector.broadcast %169 : vector<1x128xf32> to vector<24x128xf32>
    %171 = arith.addf %168, %170 : vector<24x128xf32>
    %cst_62 = arith.constant 1.702000e+00 : f32
    %172 = vector.broadcast %cst_62 : f32 to vector<24x128xf32>
    %173 = arith.mulf %172, %171 : vector<24x128xf32>
    %174 = arith.negf %173 : vector<24x128xf32>
    %175 = math.exp %174 : vector<24x128xf32>
    %cst_63 = arith.constant 1.000000e+00 : f32
    %176 = vector.broadcast %cst_63 : f32 to vector<24x128xf32>
    %177 = arith.addf %176, %175 : vector<24x128xf32>
    %178 = arith.divf %176, %177 : vector<24x128xf32>
    %179 = arith.mulf %171, %178 : vector<24x128xf32>
    %c0_64 = arith.constant 0 : index
    %c0_65 = arith.constant 0 : index
    %180 = vector.load %arg12[%c0_64, %c0_65] : memref<128x32xf32, #tpu.memory_space<vmem>>, vector<128x32xf32>
    %cst_66 = arith.constant dense<0.000000e+00> : vector<24x32xf32>
    %181 = tpu.matmul %179, %180, %cst_66 {dimension_numbers = #tpu.dot_dimension_numbers<[1], [0], [0], [1], [0, 0, 1, 1], [], []>} : vector<24x128xf32>, vector<128x32xf32>, vector<24x32xf32> -> vector<24x32xf32>
    %c0_67 = arith.constant 0 : index
    %c0_68 = arith.constant 0 : index
    %182 = vector.load %arg13[%c0_67, %c0_68] : memref<1x32xf32, #tpu.memory_space<vmem>>, vector<1x32xf32>
    %183 = vector.broadcast %182 : vector<1x32xf32> to vector<24x32xf32>
    %184 = arith.addf %181, %183 : vector<24x32xf32>
    %185 = arith.addf %142, %184 : vector<24x32xf32>
    %c0_69 = arith.constant 0 : index
    %c0_70 = arith.constant 0 : index
    %186 = vector.load %arg14[%c0_69, %c0_70] : memref<24x32xf32, #tpu.memory_space<vmem>>, vector<24x32xf32>
    tpu.vector_store %arg14[%c0_69, %c0_70], %185 {strides = array<i32>} : memref<24x32xf32, #tpu.memory_space<vmem>>, vector<24x32xf32>,
    return
  }
  func.func @transform_0(%arg0: i32) -> (i32, i32) {
    %c0_i32 = arith.constant 0 : i32
    %c0_i32_0 = arith.constant 0 : i32
    %c0_i32_1 = arith.constant 0 : i32
    return %c0_i32, %c0_i32_0 : i32, i32
  }
  func.func @transform_1(%arg0: i32) -> (i32, i32) {
    %c0_i32 = arith.constant 0 : i32
    %c0_i32_0 = arith.constant 0 : i32
    %c0_i32_1 = arith.constant 0 : i32
    return %c0_i32, %c0_i32_0 : i32, i32
  }
  func.func @transform_2(%arg0: i32) -> (i32, i32) {
    %c0_i32 = arith.constant 0 : i32
    %c0_i32_0 = arith.constant 0 : i32
    %c0_i32_1 = arith.constant 0 : i32
    return %c0_i32, %c0_i32_0 : i32, i32
  }
  func.func @transform_3(%arg0: i32) -> (i32, i32) {
    %c0_i32 = arith.constant 0 : i32
    %c0_i32_0 = arith.constant 0 : i32
    %c0_i32_1 = arith.constant 0 : i32
    return %c0_i32, %c0_i32_0 : i32, i32
  }
  func.func @transform_4(%arg0: i32) -> (i32, i32) {
    %c0_i32 = arith.constant 0 : i32
    %c0_i32_0 = arith.constant 0 : i32
    %c0_i32_1 = arith.constant 0 : i32
    return %c0_i32, %c0_i32_0 : i32, i32
  }
  func.func @transform_5(%arg0: i32) -> (i32, i32) {
    %c0_i32 = arith.constant 0 : i32
    %c0_i32_0 = arith.constant 0 : i32
    %c0_i32_1 = arith.constant 0 : i32
    return %c0_i32, %c0_i32_0 : i32, i32
  }
  func.func @transform_6(%arg0: i32) -> (i32, i32) {
    %c0_i32 = arith.constant 0 : i32
    %c0_i32_0 = arith.constant 0 : i32
    %c0_i32_1 = arith.constant 0 : i32
    return %c0_i32, %c0_i32_0 : i32, i32
  }
  func.func @transform_7(%arg0: i32) -> (i32, i32) {
    %c0_i32 = arith.constant 0 : i32
    %c0_i32_0 = arith.constant 0 : i32
    %c0_i32_1 = arith.constant 0 : i32
    return %c0_i32, %c0_i32_0 : i32, i32
  }
  func.func @transform_8(%arg0: i32) -> (i32, i32) {
    %c0_i32 = arith.constant 0 : i32
    %c0_i32_0 = arith.constant 0 : i32
    %c0_i32_1 = arith.constant 0 : i32
    return %c0_i32, %c0_i32_0 : i32, i32
  }
  func.func @transform_9(%arg0: i32) -> (i32, i32) {
    %c0_i32 = arith.constant 0 : i32
    %c0_i32_0 = arith.constant 0 : i32
    %c0_i32_1 = arith.constant 0 : i32
    return %c0_i32, %c0_i32_0 : i32, i32
  }
  func.func @transform_10(%arg0: i32) -> (i32, i32) {
    %c0_i32 = arith.constant 0 : i32
    %c0_i32_0 = arith.constant 0 : i32
    %c0_i32_1 = arith.constant 0 : i32
    return %c0_i32, %c0_i32_0 : i32, i32
  }
  func.func @transform_11(%arg0: i32) -> (i32, i32) {
    %c0_i32 = arith.constant 0 : i32
    %c0_i32_0 = arith.constant 0 : i32
    %c0_i32_1 = arith.constant 0 : i32
    return %c0_i32, %c0_i32_0 : i32, i32
  }
  func.func @transform_12(%arg0: i32) -> (i32, i32) {
    %c0_i32 = arith.constant 0 : i32
    %c0_i32_0 = arith.constant 0 : i32
    %c0_i32_1 = arith.constant 0 : i32
    return %c0_i32, %c0_i32_0 : i32, i32
  }
  func.func @transform_13(%arg0: i32) -> (i32, i32) {
    %c0_i32 = arith.constant 0 : i32
    %c0_i32_0 = arith.constant 0 : i32
    %c0_i32_1 = arith.constant 0 : i32
    return %c0_i32, %c0_i32_0 : i32, i32
  }
}

</mosaic_0001>

<bundles_post_ra>
// kernel: tpu_custom_call.1
= control target key start
LH: loop header
LB: loop body
LE: loop exit
PB: predicated region body
PF: predicated region fallthrough
CT: control target
= control target key end

     0   :  { %vm48_vm0 = vcmask 261120   ;;  %s2784_s0 = inlined_call_operand.vmem [shape: f32[24,32], index: 0, kind: input, shape index: {}]   ;;  %s2785_s1 = inlined_call_operand.vmem [shape: f32[1,32], index: 1, kind: input, shape index: {}]   ;;  %s2786_s2 = inlined_call_operand.vmem [shape: f32[1,32], index: 2, kind: input, shape index: {}]   ;;  %s2787_s3 = inlined_call_operand.vmem [shape: f32[32,96], index: 3, kind: input, shape index: {}]   ;;  %s2788_s4 = inlined_call_operand.vmem [shape: f32[1,96], index: 4, kind: input, shape index: {}]   ;;  %s2789_s5 = inlined_call_operand.vmem [shape: f32[32,32], index: 5, kind: input, shape index: {}]   ;;  %s2790_s6 = inlined_call_operand.vmem [shape: f32[1,32], index: 6, kind: input, shape index: {}]   ;;  %s2791_s7 = inlined_call_operand.vmem [shape: f32[1,32], index: 7, kind: input, shape index: {}]   ;;  %s2792_s8 = inlined_call_operand.vmem [shape: f32[1,32], index: 8, kind: input, shape index: {}]   ;;  %s2793_s9 = inlined_call_operand.vmem [shape: f32[32,128], index: 9, kind: input, shape index: {}]   ;;  %s2794_s10 = inlined_call_operand.vmem [shape: f32[1,128], index: 10, kind: input, shape index: {}]   ;;  %s2795_s11 = inlined_call_operand.vmem [shape: f32[128,32], index: 11, kind: input, shape index: {}]   ;;  %s2796_s12 = inlined_call_operand.vmem [shape: f32[1,32], index: 12, kind: input, shape index: {}]   ;;  %s2797_s13 = inlined_call_operand.hbm [shape: f32[24,32], index: 13, kind: output, shape index: {}]  }
   0x1   :  { %v45_v0 = vld [vmem:[%s2784_s0] sm:$0xff]  ;;  %v47_v1 = vld [vmem:[%s2784_s0 + $0x10] sm:$0xff]  ;;  %v46_v2 = vld [vmem:[%s2784_s0 + $0x8] sm:$0xff] }
   0x2   :  { %v49_v3 = vsel %vm48_vm0, %v45_v0, 0.0  ;;  %v55_v4 = vsel %vm48_vm0, %v47_v1, 0.0 }
   0x3   :  { %18 = vsyncpa [#allocation3], 0  ;;  %50 = vadd.xlane.f32.xlu0 %v49_v3  ;;  %56 = vadd.xlane.f32.xlu1 %v55_v4  ;;  %v52_v5 = vsel %vm48_vm0, %v46_v2, 0.0  ;;  %v112_v21 = vld [vmem:[%s2787_s3 + $0x18] sm:$0xff]  ;;  %v2145_v22 = vmov 0.0   ;;  %v111_v23 = vld [vmem:[%s2787_s3 + $0x10] sm:$0xff] }
   0x4   :  { %1818 = vmatprep.subr.mxu0 %v2145_v22  ;;  %vm2146_vm1 = vmmov 0   ;;  %1865 = vmatprep.subr.mxu1 %v2145_v22  ;;  %v110_v24 = vld [vmem:[%s2787_s3 + $0x8] sm:$0xff]  ;;  %v109_v25 = vld [vmem:[%s2787_s3] sm:$0xff]  ;;  %s2147_s25 = smov 96   ;;  %s2148_s26 = smov 88   ;;  %vm275_vm2 = vcmask 64512  }
   0x5   :  { %1826 = vmatprep.mubr.msk.f32.mxu0 %vm2146_vm1, %v2145_v22  ;;  %1819 = vmatpush3.msra.mxu0 %v112_v21  ;;  %v1674_v36 = vld [vmem:[%s2785_s1] ss:$0 sm:$0xff]  ;;  %s2150_s27 = smov 80   ;;  %s2151_s28 = smov 112   ;;  %vm371_vm4 = vcmask 195584   ;;  %vm1256_vm7 = vcmask 130048  }
   0x6   :  { %1820 = vmatprep.subr.mxu0 %v2145_v22  ;;  %1871 = vmatprep.mubr.msk.f32.mxu1 %vm2146_vm1, %v2145_v22  ;;  %v1675_v38 = vld [vmem:[%s2786_s2] ss:$0 sm:$0xff]  ;;  %s2152_s29 = smov 72   ;;  %s2153_s30 = smov 104  }
   0x7   :  { %53 = vadd.xlane.f32.xlu0 %v52_v5  ;;  %1821 = vmatpush3.msra.mxu0 %v111_v23  ;;  %v1676_v51 = vld [vmem:[%s2788_s4] ss:$0 sm:$0xff]  ;;  %s2149_s4 = smov 120   ;;  %s2154_s14 = smov 64  }
   0x8   :  { %1822 = vmatprep.subr.mxu0 %v2145_v22  ;;  %s2155_s15 = smov 56   ;;  %s2156_s16 = smov 48  }
   0x9   :  { %1823 = vmatpush3.msra.mxu0 %v110_v24  ;;  %s2157_s17 = smov 40   ;;  %s2158_s20 = smov 8  }
   0xa   :  { %1824 = vmatprep.subr.mxu0 %v2145_v22  ;;  %s2159_s21 = smov 16  }
   0xb   :  { %1825 = vmatpush3.msra.mxu0 %v109_v25 }
   0xc   :  { %1835 = vmatprep.subr.mxu0 %v2145_v22 }
  0x8c   :  { %v51_v6 = vpop.xlane.xlu0 %50  ;;  %v57_v7 = vpop.xlane.xlu1 %56 }
  0x8d   :  { %v59_v8 = vmul.f32 0.03125, %v51_v6  ;;  %v61_v9 = vmul.f32 0.03125, %v57_v7 }
  0x8f   :  { %v62_v10 = vsub.f32 %v45_v0, %v59_v8  ;;  %v64_v11 = vsub.f32 %v47_v1, %v61_v9 }
  0x90   :  { %v54_v12 = vpop.xlane.xlu0 %53 }
  0x91   :  { %v60_v13 = vmul.f32 0.03125, %v54_v12  ;;  %v65_v14 = vmul.f32 %v62_v10, %v62_v10  ;;  %v67_v15 = vmul.f32 %v64_v11, %v64_v11 }
  0x93   :  { %v63_v16 = vsub.f32 %v46_v2, %v60_v13  ;;  %v68_v17 = vsel %vm48_vm0, %v65_v14, 0.0  ;;  %v74_v18 = vsel %vm48_vm0, %v67_v15, 0.0 }
  0x94   :  { %69 = vadd.xlane.f32.xlu1 %v68_v17 }
  0x95   :  { %v66_v19 = vmul.f32 %v63_v16, %v63_v16 }
  0x97   :  { %v71_v20 = vsel %vm48_vm0, %v66_v19, 0.0  ;;  %v209_v19 = vlaneseq }
  0x98   :  { %75 = vadd.xlane.f32.xlu1 %v74_v18  ;;  %72 = vadd.xlane.f32.xlu0 %v71_v20 }
  0x99   :  { %v210_v20 = vshrl.u32 %v209_v19, 7  ;;  %v214_v21 = vand.u32 127, %v209_v19 }
  0x9b   :  { %v219_v23 = vand.u32 1, %v210_v20  ;;  %v255_v24 = vand.u32 1, %v214_v21  ;;  %v211_v25 = vadd.s32 8, %v210_v20 }
  0x9d   :  { %vm2386_vm3 = vcmp.eq.s32.totalorder %v219_v23, %v255_v24 }
 0x11d   :  { %v70_v26 = vpop.xlane.xlu1 %69 }
 0x11e   :  { %v77_v27 = vmul.f32 0.03125, %v70_v26 }
 0x120   :  { %v80_v28 = vadd.f32 1e-05, %v77_v27 }
 0x121   :  { %v76_v29 = vpop.xlane.xlu1 %75  ;;  %v73_v30 = vpop.xlane.xlu0 %72 }
 0x122   :  { %2048 = vrsqrt.f32 %v80_v28  ;;  %v79_v31 = vmul.f32 0.03125, %v76_v29  ;;  %v78_v32 = vmul.f32 0.03125, %v73_v30  ;;  %v226_v28 = vand.u32 1, %v211_v25 }
 0x123   :  { %v212_v29 = vadd.s32 16, %v210_v20 }
 0x124   :  { %v82_v33 = vadd.f32 1e-05, %v79_v31  ;;  %v81_v34 = vadd.f32 1e-05, %v78_v32  ;;  %vm2396_vm5 = vcmp.eq.s32.totalorder %v226_v28, %v255_v24 }
 0x126   :  { %2050 = vrsqrt.f32 %v82_v33 }
 0x127   :  { %2052 = vrsqrt.f32 %v81_v34 }
 0x12f   :  { %v2049_v35 = vpop.eup %2048 }
 0x130   :  { %v86_v37 = vmul.f32 %v2049_v35, %v62_v10 }
 0x132   :  { %v96_v39 = vmul.f32 %v1674_v36, %v86_v37 }
 0x133   :  { %v2051_v40 = vpop.eup %2050 }
 0x134   :  { %v2053_v41 = vpop.eup %2052  ;;  %v106_v42 = vadd.f32 %v1675_v38, %v96_v39  ;;  %v88_v44 = vmul.f32 %v2051_v40, %v64_v11 }
 0x135   :  { %v87_v43 = vmul.f32 %v2053_v41, %v63_v16 }
 0x136   :  { %1827 = vmatmul.mubr.msk.f32.vlgmr.msra.gmra.mxu0 %vm48_vm0, %v106_v42  ;;  %v98_v47 = vmul.f32 %v1674_v36, %v88_v44 }
 0x137   :  { %1829 = vmatprep.mubr.msk.f32.mxu0 %vm2146_vm1, %v2145_v22  ;;  %v97_v45 = vmul.f32 %v1674_v36, %v87_v43  ;;  %v233_v36 = vand.u32 1, %v212_v29 }
 0x138   :  { %v108_v48 = vadd.f32 %v1675_v38, %v98_v47 }
 0x139   :  { %v107_v46 = vadd.f32 %v1675_v38, %v97_v45  ;;  %vm2410_vm6 = vcmp.eq.s32.totalorder %v233_v36, %v255_v24 }
 0x13b   :  { %1830 = vmatmul.mubr.msk.f32.gmra.mxu0 %vm48_vm0, %v107_v46 }
 0x13c   :  { %1832 = vmatprep.mubr.msk.f32.mxu0 %vm2146_vm1, %v2145_v22 }
 0x13f   :  { %1833 = vmatmul.mubr.msk.f32.gmra.mxu0 %vm48_vm0, %v108_v48 }
 0x140   :  { %1841 = vmatprep.mubr.msk.f32.mxu0 %vm2146_vm1, %v2145_v22 }
 0x1f6   :  { %v195_v49 = vpop.f32.mrf.mxu0 }
 0x1f7   :  { %v2291_v56 = vadd.f32 %v1676_v51, %v195_v49 }
 0x1f8   :  { %v1828_v50 = vpop.f32.mrf.mxu0 }
 0x1fb   :  { %v200_v52 = vpop.f32.mrf.mxu0 }
 0x1fc   :  { %v2288_v53 = vadd.f32 %v1676_v51, %v200_v52 }
 0x1fd   :  { %v1831_v54 = vpop.f32.mrf.mxu0 }
 0x1fe   :  { %271 = vrot.lane.b32.xlu1 %v2288_v53, %s2147_s25 }
 0x1ff   :  { %v205_v55 = vpop.f32.mrf.mxu0 }
 0x200   :  { %v2293_v57 = vadd.f32 %v1676_v51, %v205_v55 }
 0x201   :  { %v1834_v58 = vpop.f32.mrf.mxu0 }
 0x202   :  { %269 = vrot.lane.b32.xlu1 %v2291_v56, %s2147_s25  ;;  %273 = vrot.lane.b32.xlu0 %v2293_v57, %s2147_s25  ;;  %s2160_s25 = smov 24  }
 0x206   :  { %513 = vrot.lane.b32.xlu1 %v2293_v57, %s2148_s26  ;;  %511 = vrot.lane.b32.xlu0 %v2288_v53, %s2148_s26 }
 0x20a   :  { %509 = vrot.lane.b32.xlu1 %v2291_v56, %s2148_s26  ;;  %503 = vrot.lane.b32.xlu0 %v2291_v56, %s2149_s4 }
 0x20e   :  { %751 = vrot.lane.b32.xlu1 %v2293_v57, %s2150_s27  ;;  %505 = vrot.lane.b32.xlu0 %v2288_v53, %s2149_s4 }
 0x212   :  { %749 = vrot.lane.b32.xlu1 %v2288_v53, %s2150_s27  ;;  %507 = vrot.lane.b32.xlu0 %v2293_v57, %s2149_s4  ;;  %s2161_s4 = smov [#allocation2]  }
 0x216   :  { %747 = vrot.lane.b32.xlu1 %v2291_v56, %s2150_s27  ;;  %741 = vrot.lane.b32.xlu0 %v2291_v56, %s2151_s28  ;;  %s1663_s27 = sshll.u32 %s2161_s4, 4  ;;  %s1664_s27 = int_to_ptr.vmem [resolvable:$true] %s1663_s27 }
 0x217   :  { %p2128_p1 = scmp.lt.s32.totalorder %s1664_s27, %s1664_s27 }
 0x21a   :  { %989 = vrot.lane.b32.xlu1 %v2293_v57, %s2152_s29  ;;  %743 = vrot.lane.b32.xlu0 %v2288_v53, %s2151_s28 }
 0x21e   :  { %987 = vrot.lane.b32.xlu1 %v2288_v53, %s2152_s29  ;;  %745 = vrot.lane.b32.xlu0 %v2293_v57, %s2151_s28 }
 0x222   :  { %985 = vrot.lane.b32.xlu1 %v2291_v56, %s2152_s29  ;;  %979 = vrot.lane.b32.xlu0 %v2291_v56, %s2153_s30 }
 0x226   :  { %981 = vrot.lane.b32.xlu1 %v2288_v53, %s2153_s30  ;;  %983 = vrot.lane.b32.xlu0 %v2293_v57, %s2153_s30 }
 0x22a   :  { %405 = vrot.lane.b32.xlu1 %v2291_v56, %s2154_s14  ;;  %407 = vrot.lane.b32.xlu0 %v2288_v53, %s2154_s14 }
 0x22e   :  { %409 = vrot.lane.b32.xlu1 %v2293_v57, %s2154_s14 }
 0x232   :  { %647 = vrot.lane.b32.xlu1 %v2293_v57, %s2155_s15 }
 0x270   :  { %v272_v59 = vpop.permute.xlu1 %271 }
 0x274   :  { %v270_v60 = vpop.permute.xlu1 %269  ;;  %v274_v61 = vpop.permute.xlu0 %273 }
 0x275   :  { %1836 = vmatpush3.xpose.msk.msra.mxu0 %vm275_vm2, %v274_v61 }
 0x276   :  { %1837 = vmatprep.subr.mxu0 %v2145_v22 }
 0x278   :  { %v514_v62 = vpop.permute.xlu1 %513  ;;  %v512_v63 = vpop.permute.xlu0 %511 }
 0x279   :  { %1838 = vmatpush3.xpose.msk.msra.mxu0 %vm275_vm2, %v272_v59  ;;  %1866 = vmatpush3.xpose.msk.msra.mxu1 %vm275_vm2, %v514_v62 }
 0x27a   :  { %1867 = vmatprep.subr.mxu1 %v2145_v22  ;;  %1839 = vmatprep.subr.mxu0 %v2145_v22 }
 0x27c   :  { %v510_v0 = vpop.permute.xlu1 %509  ;;  %v504_v1 = vpop.permute.xlu0 %503 }
 0x27d   :  { %1840 = vmatpush3.xpose.msk.msra.mxu0 %vm275_vm2, %v270_v60  ;;  %1868 = vmatpush3.xpose.msk.msra.mxu1 %vm275_vm2, %v512_v63 }
 0x27e   :  { %1869 = vmatprep.subr.mxu1 %v2145_v22  ;;  %1850 = vmatprep.subr.mxu0 %v2145_v22 }
 0x280   :  { %v752_v2 = vpop.permute.xlu1 %751  ;;  %1842 = vmatmul.mubr.msk.f32.vlgmr.msra.gmra.mxu0 %vm275_vm2, %v2291_v56  ;;  %v506_v3 = vpop.permute.xlu0 %505 }
 0x281   :  { %1870 = vmatpush3.xpose.msk.msra.mxu1 %vm275_vm2, %v510_v0  ;;  %1844 = vmatprep.mubr.msk.f32.mxu0 %vm2146_vm1, %v2145_v22 }
 0x282   :  { %1895 = vmatprep.subr.mxu1 %v2145_v22 }
 0x284   :  { %v750_v4 = vpop.permute.xlu1 %749  ;;  %1845 = vmatmul.mubr.msk.f32.gmra.mxu0 %vm275_vm2, %v2288_v53  ;;  %1872 = vmatmul.mubr.msk.f32.vlgmr.msra.gmra.mxu1 %vm275_vm2, %v504_v1  ;;  %v508_v5 = vpop.permute.xlu0 %507 }
 0x285   :  { %1896 = vmatpush3.xpose.msk.msra.mxu1 %vm275_vm2, %v752_v2  ;;  %1847 = vmatprep.mubr.msk.f32.mxu0 %vm2146_vm1, %v2145_v22 }
 0x286   :  { %1874 = vmatprep.mubr.msk.f32.mxu1 %vm2146_vm1, %v2145_v22  ;;  %1897 = vmatprep.subr.mxu1 %v2145_v22 }
 0x288   :  { %v748_v6 = vpop.permute.xlu1 %747  ;;  %1848 = vmatmul.mubr.msk.f32.gmra.mxu0 %vm275_vm2, %v2293_v57  ;;  %1875 = vmatmul.mubr.msk.f32.gmra.mxu1 %vm275_vm2, %v506_v3  ;;  %v742_v7 = vpop.permute.xlu0 %741 }
 0x289   :  { %1898 = vmatpush3.xpose.msk.msra.mxu1 %vm275_vm2, %v750_v4  ;;  %1877 = vmatprep.mubr.msk.f32.mxu1 %vm2146_vm1, %v2145_v22 }
 0x28a   :  { %1899 = vmatprep.subr.mxu1 %v2145_v22  ;;  %1856 = vmatprep.mubr.msk.f32.mxu0 %vm2146_vm1, %v2145_v22 }
 0x28c   :  { %v990_v8 = vpop.permute.xlu1 %989  ;;  %1878 = vmatmul.mubr.msk.f32.gmra.mxu1 %vm275_vm2, %v508_v5  ;;  %v744_v9 = vpop.permute.xlu0 %743 }
 0x28d   :  { %1900 = vmatpush3.xpose.msk.msra.mxu1 %vm275_vm2, %v748_v6  ;;  %1901 = vmatprep.mubr.msk.f32.mxu1 %vm2146_vm1, %v2145_v22 }
 0x28e   :  { %1925 = vmatprep.subr.mxu1 %v2145_v22 }
 0x290   :  { %v988_v10 = vpop.permute.xlu1 %987  ;;  %1902 = vmatmul.mubr.msk.f32.vlgmr.msra.gmra.mxu1 %vm275_vm2, %v742_v7  ;;  %v746_v11 = vpop.permute.xlu0 %745 }
 0x291   :  { %1926 = vmatpush3.xpose.msk.msra.mxu1 %vm275_vm2, %v990_v8  ;;  %1904 = vmatprep.mubr.msk.f32.mxu1 %vm2146_vm1, %v2145_v22 }
 0x292   :  { %1927 = vmatprep.subr.mxu1 %v2145_v22 }
 0x294   :  { %v986_v12 = vpop.permute.xlu1 %985  ;;  %1905 = vmatmul.mubr.msk.f32.gmra.mxu1 %vm275_vm2, %v744_v9  ;;  %v980_v13 = vpop.permute.xlu0 %979 }
 0x295   :  { %1928 = vmatpush3.xpose.msk.msra.mxu1 %vm275_vm2, %v988_v10  ;;  %1907 = vmatprep.mubr.msk.f32.mxu1 %vm2146_vm1, %v2145_v22 }
 0x296   :  { %1929 = vmatprep.subr.mxu1 %v2145_v22 }
 0x298   :  { %v982_v14 = vpop.permute.xlu1 %981  ;;  %1908 = vmatmul.mubr.msk.f32.gmra.mxu1 %vm275_vm2, %v746_v11  ;;  %v984_v15 = vpop.permute.xlu0 %983 }
 0x299   :  { %1930 = vmatpush3.xpose.msk.msra.mxu1 %vm275_vm2, %v986_v12  ;;  %1931 = vmatprep.mubr.msk.f32.mxu1 %vm2146_vm1, %v2145_v22 }
 0x29a   :  { %1955 = vmatprep.subr.mxu1 %v2145_v22 }
 0x29c   :  { %v406_v16 = vpop.permute.xlu1 %405  ;;  %1932 = vmatmul.mubr.msk.f32.vlgmr.msra.gmra.mxu1 %vm275_vm2, %v980_v13  ;;  %v408_v18 = vpop.permute.xlu0 %407 }
 0x29d   :  { %1934 = vmatprep.mubr.msk.f32.mxu1 %vm2146_vm1, %v2145_v22 }
 0x2a0   :  { %v410_v17 = vpop.permute.xlu1 %409  ;;  %1935 = vmatmul.mubr.msk.f32.gmra.mxu1 %vm275_vm2, %v982_v14 }
 0x2a1   :  { %1851 = vmatpush3.msra.mxu0 %v410_v17  ;;  %1937 = vmatprep.mubr.msk.f32.mxu1 %vm2146_vm1, %v2145_v22 }
 0x2a2   :  { %1852 = vmatprep.subr.mxu0 %v2145_v22 }
 0x2a3   :  { %1853 = vmatpush3.msra.mxu0 %v408_v18 }
 0x2a4   :  { %1854 = vmatprep.subr.mxu0 %v2145_v22  ;;  %1938 = vmatmul.mubr.msk.f32.gmra.mxu1 %vm275_vm2, %v984_v15  ;;  %v2476_v19 = vpop.permute.xlu1 %647 }
 0x2a5   :  { %1855 = vmatpush3.msra.mxu0 %v406_v16  ;;  %1963 = vmatprep.mubr.msk.f32.mxu1 %vm2146_vm1, %v2145_v22 }
 0x2a6   :  { %1880 = vmatprep.subr.mxu0 %v2145_v22 }
 0x340   :  { %v354_v27 = vpop.f32.mrf.mxu0 }
 0x341   :  { %v2392_v30 = vsel %vm2386_vm3, %v354_v27, -1e+30 }
 0x342   :  { %v1843_v31 = vpop.f32.mrf.mxu0  ;;  %v372_v32 = vsel %vm371_vm4, %v2392_v30, -inf }
 0x343   :  { %373 = vmax.xlane.f32.xlu1 %v372_v32 }
 0x344   :  { %v359_v34 = vpop.f32.mrf.mxu0  ;;  %v593_v35 = vpop.f32.mrf.mxu1 }
 0x345   :  { %v2402_v37 = vsel %vm2386_vm3, %v593_v35, -1e+30  ;;  %v2408_v41 = vsel %vm2396_vm5, %v359_v34, -1e+30 }
 0x346   :  { %v1846_v38 = vpop.f32.mrf.mxu0  ;;  %v1873_v39 = vpop.f32.mrf.mxu1  ;;  %v610_v40 = vsel %vm371_vm4, %v2402_v37, -inf  ;;  %v375_v49 = vsel %vm371_vm4, %v2408_v41, -inf }
 0x347   :  { %611 = vmax.xlane.f32.xlu0 %v610_v40 }
 0x348   :  { %v364_v43 = vpop.f32.mrf.mxu0  ;;  %v598_v44 = vpop.f32.mrf.mxu1 }
 0x349   :  { %v2416_v45 = vsel %vm2396_vm5, %v598_v44, -1e+30  ;;  %v2424_v50 = vsel %vm2410_vm6, %v364_v43, -1e+30 }
 0x34a   :  { %v1849_v46 = vpop.f32.mrf.mxu0  ;;  %v1876_v47 = vpop.f32.mrf.mxu1  ;;  %v613_v48 = vsel %vm371_vm4, %v2416_v45, -inf  ;;  %v378_v54 = vsel %vm371_vm4, %v2424_v50, -inf }
 0x34b   :  { %614 = vmax.xlane.f32.xlu1 %v613_v48  ;;  %376 = vmax.xlane.f32.xlu0 %v375_v49 }
 0x34c   :  { %v603_v51 = vpop.f32.mrf.mxu1 }
 0x34d   :  { %v2430_v55 = vsel %vm2410_vm6, %v603_v51, -1e+30 }
 0x34e   :  { %v1879_v52 = vpop.f32.mrf.mxu1  ;;  %v616_v62 = vsel %vm371_vm4, %v2430_v55, -inf }
 0x34f   :  { %379 = vmax.xlane.f32.xlu0 %v378_v54 }
 0x350   :  { %v831_v58 = vpop.f32.mrf.mxu1 }
 0x351   :  { %v2434_v59 = vsel %vm2386_vm3, %v831_v58, -1e+30 }
 0x352   :  { %v1903_v60 = vpop.f32.mrf.mxu1  ;;  %v848_v61 = vsel %vm371_vm4, %v2434_v59, -inf }
 0x353   :  { %849 = vmax.xlane.f32.xlu1 %v848_v61  ;;  %617 = vmax.xlane.f32.xlu0 %v616_v62 }
 0x354   :  { %v836_v63 = vpop.f32.mrf.mxu1 }
 0x355   :  { %v2442_v0 = vsel %vm2396_vm5, %v836_v63, -1e+30 }
 0x356   :  { %v1906_v1 = vpop.f32.mrf.mxu1  ;;  %v851_v2 = vsel %vm371_vm4, %v2442_v0, -inf }
 0x357   :  { %852 = vmax.xlane.f32.xlu0 %v851_v2 }
 0x358   :  { %v841_v3 = vpop.f32.mrf.mxu1 }
 0x359   :  { %v2448_v4 = vsel %vm2410_vm6, %v841_v3, -1e+30 }
 0x35a   :  { %v1909_v5 = vpop.f32.mrf.mxu1  ;;  %v854_v6 = vsel %vm371_vm4, %v2448_v4, -inf }
 0x35b   :  { %855 = vmax.xlane.f32.xlu1 %v854_v6 }
 0x35c   :  { %v1069_v7 = vpop.f32.mrf.mxu1 }
 0x35d   :  { %v2454_v8 = vsel %vm2386_vm3, %v1069_v7, -1e+30 }
 0x35e   :  { %v1933_v9 = vpop.f32.mrf.mxu1  ;;  %v1086_v10 = vsel %vm371_vm4, %v2454_v8, -inf }
 0x35f   :  { %1087 = vmax.xlane.f32.xlu0 %v1086_v10 }
 0x360   :  { %v1074_v11 = vpop.f32.mrf.mxu1 }
 0x361   :  { %v2466_v15 = vsel %vm2396_vm5, %v1074_v11, -1e+30 }
 0x362   :  { %v1936_v12 = vpop.f32.mrf.mxu1  ;;  %v1089_v17 = vsel %vm371_vm4, %v2466_v15, -inf }
 0x364   :  { %v1079_v13 = vpop.f32.mrf.mxu1 }
 0x365   :  { %v2470_v16 = vsel %vm2410_vm6, %v1079_v13, -1e+30 }
 0x366   :  { %v1939_v14 = vpop.f32.mrf.mxu1  ;;  %v1092_v18 = vsel %vm371_vm4, %v2470_v16, -inf }
 0x36c   :  { %643 = vrot.lane.b32.xlu1 %v2291_v56, %s2155_s15 }
 0x370   :  { %885 = vrot.lane.b32.xlu1 %v2293_v57, %s2156_s16 }
 0x375   :  { %645 = vrot.lane.b32.xlu0 %v2288_v53, %s2155_s15 }
 0x394   :  { %1090 = vmax.xlane.f32.xlu1 %v1089_v17  ;;  %1093 = vmax.xlane.f32.xlu0 %v1092_v18 }
 0x3cc   :  { %v374_v20 = vpop.xlane.xlu1 %373 }
 0x3cd   :  { %v381_v21 = vsub.f32 %v2392_v30, %v374_v20 }
 0x3cf   :  { %v384_v23 = vmul.f32 1.442695, %v381_v21 }
 0x3d0   :  { %v612_v24 = vpop.xlane.xlu0 %611 }
 0x3d1   :  { %2054 = vpow2.f32 %v384_v23  ;;  %v619_v25 = vsub.f32 %v2402_v37, %v612_v24 }
 0x3d3   :  { %v622_v26 = vmul.f32 1.442695, %v619_v25 }
 0x3d4   :  { %v377_v27 = vpop.xlane.xlu0 %376  ;;  %v615_v36 = vpop.xlane.xlu1 %614 }
 0x3d5   :  { %2056 = vpow2.f32 %v622_v26  ;;  %v382_v28 = vsub.f32 %v2408_v41, %v377_v27  ;;  %v620_v37 = vsub.f32 %v2416_v45, %v615_v36 }
 0x3d7   :  { %v386_v29 = vmul.f32 1.442695, %v382_v28  ;;  %v624_v39 = vmul.f32 1.442695, %v620_v37 }
 0x3d8   :  { %v380_v38 = vpop.xlane.xlu0 %379 }
 0x3d9   :  { %2058 = vpow2.f32 %v386_v29  ;;  %v383_v40 = vsub.f32 %v2424_v50, %v380_v38 }
 0x3da   :  { %2060 = vpow2.f32 %v624_v39 }
 0x3db   :  { %v388_v42 = vmul.f32 1.442695, %v383_v40 }
 0x3dc   :  { %v618_v41 = vpop.xlane.xlu0 %617  ;;  %v850_v44 = vpop.xlane.xlu1 %849 }
 0x3dd   :  { %v621_v43 = vsub.f32 %v2430_v55, %v618_v41  ;;  %2062 = vpow2.f32 %v388_v42  ;;  %v857_v46 = vsub.f32 %v2434_v59, %v850_v44 }
 0x3de   :  { %v2481_v31 = vpop.eup %2054 }
 0x3df   :  { %v390_v32 = vsel %vm371_vm4, %v2481_v31, 0.0  ;;  %v626_v47 = vmul.f32 1.442695, %v621_v43  ;;  %v860_v45 = vmul.f32 1.442695, %v857_v46 }
 0x3e0   :  { %391 = vadd.xlane.f32.xlu1 %v390_v32  ;;  %v853_v48 = vpop.xlane.xlu0 %852 }
 0x3e1   :  { %2064 = vpow2.f32 %v626_v47 }
 0x3e2   :  { %v2485_v33 = vpop.eup %2056  ;;  %2066 = vpow2.f32 %v860_v45 }
 0x3e3   :  { %v628_v30 = vsel %vm371_vm4, %v2485_v33, 0.0 }
 0x3e4   :  { %629 = vadd.xlane.f32.xlu0 %v628_v30  ;;  %v856_v49 = vpop.xlane.xlu1 %855 }
 0x3e5   :  { %v859_v51 = vsub.f32 %v2448_v4, %v856_v49 }
 0x3e6   :  { %v2489_v34 = vpop.eup %2058 }
 0x3e7   :  { %v393_v35 = vsel %vm371_vm4, %v2489_v34, 0.0  ;;  %v2502_v54 = vpop.eup %2060  ;;  %v864_v50 = vmul.f32 1.442695, %v859_v51 }
 0x3e8   :  { %394 = vadd.xlane.f32.xlu0 %v393_v35  ;;  %v1088_v52 = vpop.xlane.xlu0 %1087  ;;  %v631_v55 = vsel %vm371_vm4, %v2502_v54, 0.0  ;;  %v644_v11 = vpop.permute.xlu1 %643 }
 0x3e9   :  { %v1095_v58 = vsub.f32 %v2454_v8, %v1088_v52  ;;  %2068 = vpow2.f32 %v864_v50 }
 0x3ea   :  { %v2507_v60 = vpop.eup %2062 }
 0x3eb   :  { %v1098_v59 = vmul.f32 1.442695, %v1095_v58  ;;  %v396_v61 = vsel %vm371_vm4, %v2507_v60, 0.0 }
 0x3ec   :  { %v646_v62 = vpop.permute.xlu0 %645  ;;  %v886_v14 = vpop.permute.xlu1 %885 }
 0x3ed   :  { %2070 = vpow2.f32 %v1098_v59 }
 0x3ee   :  { %v2511_v63 = vpop.eup %2064 }
 0x3ef   :  { %v634_v1 = vsel %vm371_vm4, %v2511_v63, 0.0  ;;  %v2515_v3 = vpop.eup %2066 }
 0x3f0   :  { %v866_v6 = vsel %vm371_vm4, %v2515_v3, 0.0 }
 0x3f1   :  { %881 = vrot.lane.b32.xlu1 %v2291_v56, %s2156_s16 }
 0x3f6   :  { %v2520_v7 = vpop.eup %2068 }
 0x3f7   :  { %v872_v8 = vsel %vm371_vm4, %v2520_v7, 0.0 }
 0x3fa   :  { %v2524_v9 = vpop.eup %2070 }
 0x3fb   :  { %v1104_v10 = vsel %vm371_vm4, %v2524_v9, 0.0 }
 0x3fe   :  { %883 = vrot.lane.b32.xlu0 %v2288_v53, %s2156_s16 }
 0x415   :  { %632 = vadd.xlane.f32.xlu1 %v631_v55 }
 0x419   :  { %397 = vadd.xlane.f32.xlu1 %v396_v61 }
 0x41d   :  { %v1094_v2 = vpop.xlane.xlu0 %1093  ;;  %635 = vadd.xlane.f32.xlu0 %v634_v1  ;;  %v1091_v17 = vpop.xlane.xlu1 %1090 }
 0x41e   :  { %v1097_v4 = vsub.f32 %v2470_v16, %v1094_v2  ;;  %v858_v16 = vsub.f32 %v2442_v0, %v853_v48  ;;  %v1096_v20 = vsub.f32 %v2466_v15, %v1091_v17 }
 0x420   :  { %v1102_v5 = vmul.f32 1.442695, %v1097_v4  ;;  %v862_v18 = vmul.f32 1.442695, %v858_v16  ;;  %v1100_v21 = vmul.f32 1.442695, %v1096_v20 }
 0x421   :  { %867 = vadd.xlane.f32.xlu0 %v866_v6  ;;  %v1264_v20 = vld [vmem:[%s2789_s5 + $0x8] sm:$0xff] }
 0x422   :  { %2072 = vpow2.f32 %v1102_v5 }
 0x423   :  { %2074 = vpow2.f32 %v862_v18  ;;  %v1265_v18 = vld [vmem:[%s2789_s5 + $0x10] sm:$0xff] }
 0x424   :  { %2076 = vpow2.f32 %v1100_v21  ;;  %v1263_v21 = vld [vmem:[%s2789_s5] sm:$0xff] }
 0x425   :  { %873 = vadd.xlane.f32.xlu0 %v872_v8 }
 0x429   :  { %1105 = vadd.xlane.f32.xlu0 %v1104_v10 }
 0x42a   :  { %1123 = vrot.lane.b32.xlu1 %v2293_v57, %s2157_s17 }
 0x42f   :  { %v2529_v12 = vpop.eup %2072 }
 0x430   :  { %v1110_v13 = vsel %vm371_vm4, %v2529_v12, 0.0  ;;  %v2536_v57 = vpop.eup %2074 }
 0x431   :  { %1111 = vadd.xlane.f32.xlu0 %v1110_v13  ;;  %v869_v23 = vsel %vm371_vm4, %v2536_v57, 0.0  ;;  %v2540_v24 = vpop.eup %2076 }
 0x432   :  { %v1107_v0 = vsel %vm371_vm4, %v2540_v24, 0.0 }
 0x447   :  { %1119 = vrot.lane.b32.xlu0 %v2291_v56, %s2157_s17 }
 0x44e   :  { %870 = vadd.xlane.f32.xlu1 %v869_v23 }
 0x452   :  { %1108 = vadd.xlane.f32.xlu1 %v1107_v0 }
 0x463   :  { %1121 = vrot.lane.b32.xlu1 %v2288_v53, %s2157_s17 }
 0x469   :  { %v392_v15 = vpop.xlane.xlu1 %391 }
 0x46a   :  { %2078 = vrcp.f32 %v392_v15 }
 0x46d   :  { %v630_v25 = vpop.xlane.xlu0 %629 }
 0x471   :  { %v395_v26 = vpop.xlane.xlu0 %394 }
 0x472   :  { %2080 = vrcp.f32 %v395_v26 }
 0x475   :  { %v884_v32 = vpop.permute.xlu0 %883 }
 0x477   :  { %v2079_v56 = vpop.eup %2078 }
 0x478   :  { %v402_v27 = vmul.f32 %v2079_v56, %v2481_v31 }
 0x47a   :  { %1857 = vmatmul.mubr.msk.f32.vlgmr.msra.gmra.mxu0 %vm371_vm4, %v402_v27 }
 0x47b   :  { %1881 = vmatpush3.msra.mxu0 %v2476_v19  ;;  %1859 = vmatprep.mubr.msk.f32.mxu0 %vm2146_vm1, %v2145_v22  ;;  %v882_v19 = vpop.permute.xlu1 %881 }
 0x47c   :  { %1882 = vmatprep.subr.mxu0 %v2145_v22 }
 0x47d   :  { %1883 = vmatpush3.msra.mxu0 %v646_v62 }
 0x47e   :  { %1884 = vmatprep.subr.mxu0 %v2145_v22 }
 0x47f   :  { %1885 = vmatpush3.msra.mxu0 %v644_v11  ;;  %v2081_v53 = vpop.eup %2080 }
 0x480   :  { %1910 = vmatprep.subr.mxu0 %v2145_v22  ;;  %v403_v28 = vmul.f32 %v2081_v53, %v2489_v34 }
 0x482   :  { %1860 = vmatmul.mubr.msk.f32.gmra.mxu0 %vm371_vm4, %v403_v28 }
 0x483   :  { %1862 = vmatprep.mubr.msk.f32.mxu0 %vm2146_vm1, %v2145_v22 }
 0x49e   :  { %v633_v29 = vpop.xlane.xlu1 %632 }
 0x4a2   :  { %v398_v31 = vpop.xlane.xlu1 %397 }
 0x4a3   :  { %2082 = vrcp.f32 %v398_v31 }
 0x4a4   :  { %2084 = vrcp.f32 %v630_v25 }
 0x4a5   :  { %2086 = vrcp.f32 %v633_v29 }
 0x4a6   :  { %v636_v30 = vpop.xlane.xlu0 %635  ;;  %v1124_v44 = vpop.permute.xlu1 %1123 }
 0x4a7   :  { %2088 = vrcp.f32 %v636_v30 }
 0x4aa   :  { %v868_v35 = vpop.xlane.xlu0 %867 }
 0x4ab   :  { %2090 = vrcp.f32 %v868_v35 }
 0x4ae   :  { %v874_v46 = vpop.xlane.xlu0 %873 }
 0x4b0   :  { %v2083_v36 = vpop.eup %2082 }
 0x4b1   :  { %v404_v37 = vmul.f32 %v2083_v36, %v2507_v60  ;;  %v2085_v34 = vpop.eup %2084 }
 0x4b2   :  { %v640_v38 = vmul.f32 %v2085_v34, %v2485_v33  ;;  %v2087_v39 = vpop.eup %2086  ;;  %v1106_v47 = vpop.xlane.xlu0 %1105 }
 0x4b3   :  { %1863 = vmatmul.mubr.msk.f32.gmra.mxu0 %vm371_vm4, %v404_v37  ;;  %v641_v40 = vmul.f32 %v2087_v39, %v2502_v54 }
 0x4b4   :  { %1886 = vmatprep.mubr.msk.f32.mxu0 %vm2146_vm1, %v2145_v22  ;;  %v2089_v41 = vpop.eup %2088 }
 0x4b5   :  { %v642_v33 = vmul.f32 %v2089_v41, %v2511_v63 }
 0x4b7   :  { %1887 = vmatmul.mubr.msk.f32.vlgmr.msra.gmra.mxu0 %vm371_vm4, %v640_v38 }
 0x4b8   :  { %1911 = vmatpush3.msra.mxu0 %v886_v14  ;;  %1889 = vmatprep.mubr.msk.f32.mxu0 %vm2146_vm1, %v2145_v22  ;;  %v2091_v42 = vpop.eup %2090 }
 0x4b9   :  { %1912 = vmatprep.subr.mxu0 %v2145_v22  ;;  %v878_v43 = vmul.f32 %v2091_v42, %v2515_v3 }
 0x4ba   :  { %1913 = vmatpush3.msra.mxu0 %v884_v32  ;;  %v1112_v49 = vpop.xlane.xlu0 %1111 }
 0x4bb   :  { %1914 = vmatprep.subr.mxu0 %v2145_v22  ;;  %1890 = vmatmul.mubr.msk.f32.gmra.mxu0 %vm371_vm4, %v641_v40 }
 0x4bc   :  { %1915 = vmatpush3.msra.mxu0 %v882_v19  ;;  %1892 = vmatprep.mubr.msk.f32.mxu0 %vm2146_vm1, %v2145_v22 }
 0x4bd   :  { %1940 = vmatprep.subr.mxu0 %v2145_v22 }
 0x4be   :  { %v1120_v52 = vpop.permute.xlu0 %1119 }
 0x4bf   :  { %1893 = vmatmul.mubr.msk.f32.gmra.mxu0 %vm371_vm4, %v642_v33 }
 0x4c0   :  { %1916 = vmatprep.mubr.msk.f32.mxu0 %vm2146_vm1, %v2145_v22 }
 0x4c3   :  { %1917 = vmatmul.mubr.msk.f32.vlgmr.msra.gmra.mxu0 %vm371_vm4, %v878_v43 }
 0x4c4   :  { %1941 = vmatpush3.msra.mxu0 %v1124_v44  ;;  %1919 = vmatprep.mubr.msk.f32.mxu0 %vm2146_vm1, %v2145_v22 }
 0x4c5   :  { %1942 = vmatprep.subr.mxu0 %v2145_v22 }
 0x4d7   :  { %v871_v48 = vpop.xlane.xlu1 %870 }
 0x4d8   :  { %2092 = vrcp.f32 %v871_v48 }
 0x4d9   :  { %2094 = vrcp.f32 %v874_v46  ;;  %v1716_v46 = vld [vmem:[%s2790_s6] ss:$0 sm:$0xff] }
 0x4da   :  { %2096 = vrcp.f32 %v1106_v47 }
 0x4db   :  { %v1109_v45 = vpop.xlane.xlu1 %1108 }
 0x4dc   :  { %2098 = vrcp.f32 %v1109_v45  ;;  %v2120_v45 = vld [vmem:[%s2784_s0] sm:$0xff] }
 0x4dd   :  { %2100 = vrcp.f32 %v1112_v49 }
 0x4df   :  { %v1122_v51 = vpop.permute.xlu1 %1121 }
 0x4e0   :  { %1943 = vmatpush3.msra.mxu0 %v1122_v51 }
 0x4e1   :  { %1944 = vmatprep.subr.mxu0 %v2145_v22 }
 0x4e2   :  { %1945 = vmatpush3.msra.mxu0 %v1120_v52 }
 0x4e3   :  { %1972 = vmatprep.subr.mxu0 %v2145_v22 }
 0x4e5   :  { %v2093_v54 = vpop.eup %2092 }
 0x4e6   :  { %v879_v50 = vmul.f32 %v2093_v54, %v2536_v57  ;;  %v2095_v58 = vpop.eup %2094 }
 0x4e7   :  { %v880_v55 = vmul.f32 %v2095_v58, %v2520_v7  ;;  %v2097_v60 = vpop.eup %2096 }
 0x4e8   :  { %1920 = vmatmul.mubr.msk.f32.gmra.mxu0 %vm371_vm4, %v879_v50  ;;  %v1116_v59 = vmul.f32 %v2097_v60, %v2524_v9  ;;  %v1266_v9 = vld [vmem:[%s2789_s5 + $0x18] sm:$0xff] }
 0x4e9   :  { %1922 = vmatprep.mubr.msk.f32.mxu0 %vm2146_vm1, %v2145_v22  ;;  %v2099_v61 = vpop.eup %2098  ;;  %1956 = vmatpush3.msra.mxu1 %v1266_v9 }
 0x4ea   :  { %v1117_v62 = vmul.f32 %v2099_v61, %v2540_v24  ;;  %v2101_v63 = vpop.eup %2100  ;;  %1957 = vmatprep.subr.mxu1 %v2145_v22 }
 0x4eb   :  { %v1118_v1 = vmul.f32 %v2101_v63, %v2529_v12  ;;  %1958 = vmatpush3.msra.mxu1 %v1265_v18 }
 0x4ec   :  { %1923 = vmatmul.mubr.msk.f32.gmra.mxu0 %vm371_vm4, %v880_v55  ;;  %1959 = vmatprep.subr.mxu1 %v2145_v22  ;;  %v2121_v55 = vld [vmem:[%s2784_s0 + $0x8] sm:$0xff] }
 0x4ed   :  { %1946 = vmatprep.mubr.msk.f32.mxu0 %vm2146_vm1, %v2145_v22  ;;  %1960 = vmatpush3.msra.mxu1 %v1264_v20 }
 0x4ee   :  { %1961 = vmatprep.subr.mxu1 %v2145_v22 }
 0x4ef   :  { %1962 = vmatpush3.msra.mxu1 %v1263_v21  ;;  %v1428_v21 = vld [vmem:[%s2793_s9 + $0x18] sm:$0xff] }
 0x4f0   :  { %1947 = vmatmul.mubr.msk.f32.vlgmr.msra.gmra.mxu0 %vm371_vm4, %v1116_v59  ;;  %1989 = vmatprep.subr.mxu1 %v2145_v22 }
 0x4f1   :  { %1949 = vmatprep.mubr.msk.f32.mxu0 %vm2146_vm1, %v2145_v22  ;;  %1973 = vmatpush3.msra.mxu0 %v1428_v21 }
 0x4f2   :  { %1974 = vmatprep.subr.mxu0 %v2145_v22 }
 0x4f4   :  { %1950 = vmatmul.mubr.msk.f32.gmra.mxu0 %vm371_vm4, %v1117_v62 }
 0x4f5   :  { %1952 = vmatprep.mubr.msk.f32.mxu0 %vm2146_vm1, %v2145_v22 }
 0x4f8   :  { %1953 = vmatmul.mubr.msk.f32.gmra.mxu0 %vm371_vm4, %v1118_v1  ;;  %v2122_v1 = vld [vmem:[%s2784_s0 + $0x10] sm:$0xff] }
 0x4f9   :  { %1980 = vmatprep.mubr.msk.f32.mxu0 %vm2146_vm1, %v2145_v22 }
 0x53a   :  { %v489_v2 = vpop.f32.mrf.mxu0 }
 0x53c   :  { %v1858_v3 = vpop.f32.mrf.mxu0 }
 0x542   :  { %v494_v4 = vpop.f32.mrf.mxu0 }
 0x544   :  { %v1861_v5 = vpop.f32.mrf.mxu0 }
 0x573   :  { %v2603_v6 = vpop.f32.mrf.mxu0 }
 0x575   :  { %v1864_v7 = vpop.f32.mrf.mxu0 }
 0x577   :  { %v727_v8 = vpop.f32.mrf.mxu0 }
 0x578   :  { %1220 = vrot.lane.b32.xlu1 %v727_v8, %s2158_s20 }
 0x579   :  { %v1888_v10 = vpop.f32.mrf.mxu0 }
 0x57b   :  { %v732_v11 = vpop.f32.mrf.mxu0 }
 0x57c   :  { %1222 = vrot.lane.b32.xlu0 %v732_v11, %s2158_s20 }
 0x57d   :  { %v1891_v12 = vpop.f32.mrf.mxu0 }
 0x57f   :  { %v737_v13 = vpop.f32.mrf.mxu0 }
 0x581   :  { %v1894_v14 = vpop.f32.mrf.mxu0 }
 0x583   :  { %v965_v16 = vpop.f32.mrf.mxu0 }
 0x584   :  { %1232 = vrot.lane.b32.xlu0 %v965_v16, %s2159_s21 }
 0x585   :  { %v1918_v17 = vpop.f32.mrf.mxu0 }
 0x5a8   :  { %v970_v57 = vpop.f32.mrf.mxu0 }
 0x5a9   :  { %1234 = vrot.lane.b32.xlu1 %v970_v57, %s2159_s21  ;;  %v1427_v57 = vld [vmem:[%s2793_s9 + $0x10] sm:$0xff] }
 0x5aa   :  { %v1921_v23 = vpop.f32.mrf.mxu0  ;;  %1975 = vmatpush3.msra.mxu0 %v1427_v57 }
 0x5ab   :  { %v1426_v23 = vld [vmem:[%s2793_s9 + $0x8] sm:$0xff]  ;;  %1976 = vmatprep.subr.mxu0 %v2145_v22 }
 0x5ac   :  { %v975_v24 = vpop.f32.mrf.mxu0  ;;  %1977 = vmatpush3.msra.mxu0 %v1426_v23 }
 0x5ad   :  { %1978 = vmatprep.subr.mxu0 %v2145_v22 }
 0x5ae   :  { %v1924_v0 = vpop.f32.mrf.mxu0 }
 0x5b0   :  { %v1203_v15 = vpop.f32.mrf.mxu0 }
 0x5b1   :  { %1244 = vrot.lane.b32.xlu1 %v1203_v15, %s2160_s25 }
 0x5b2   :  { %v1948_v25 = vpop.f32.mrf.mxu0 }
 0x5b4   :  { %v1208_v26 = vpop.f32.mrf.mxu0 }
 0x5b5   :  { %1224 = vrot.lane.b32.xlu1 %v737_v13, %s2158_s20  ;;  %1246 = vrot.lane.b32.xlu0 %v1208_v26, %s2160_s25 }
 0x5b6   :  { %v1951_v56 = vpop.f32.mrf.mxu0 }
 0x5b8   :  { %v1213_v27 = vpop.f32.mrf.mxu0 }
 0x5b9   :  { %1236 = vrot.lane.b32.xlu0 %v975_v24, %s2159_s21  ;;  %1248 = vrot.lane.b32.xlu1 %v1213_v27, %s2160_s25  ;;  %v1425_v24 = vld [vmem:[%s2793_s9] sm:$0xff] }
 0x5ba   :  { %v1954_v53 = vpop.f32.mrf.mxu0  ;;  %1979 = vmatpush3.msra.mxu0 %v1425_v24 }
 0x5ea   :  { %v1221_v28 = vpop.permute.xlu1 %1220 }
 0x5eb   :  { %v1253_v32 = vsel %vm275_vm2, %v489_v2, %v1221_v28 }
 0x5ee   :  { %v1223_v19 = vpop.permute.xlu0 %1222 }
 0x5ef   :  { %v1254_v37 = vsel %vm275_vm2, %v494_v4, %v1223_v19 }
 0x5f6   :  { %v1233_v31 = vpop.permute.xlu0 %1232 }
 0x5f7   :  { %v1257_v30 = vsel %vm1256_vm7, %v1253_v32, %v1233_v31  ;;  %v1720_v31 = vld [vmem:[%s2791_s7] ss:$0 sm:$0xff] }
 0x61b   :  { %v1235_v29 = vpop.permute.xlu1 %1234 }
 0x61c   :  { %v1258_v34 = vsel %vm1256_vm7, %v1254_v37, %v1235_v29 }
 0x623   :  { %v1245_v35 = vpop.permute.xlu1 %1244 }
 0x624   :  { %v1260_v36 = vsel %vm371_vm4, %v1257_v30, %v1245_v35  ;;  %v1721_v30 = vld [vmem:[%s2792_s8] ss:$0 sm:$0xff] }
 0x625   :  { %1964 = vmatmul.mubr.msk.f32.vlgmr.msra.gmra.mxu1 %vm48_vm0, %v1260_v36 }
 0x626   :  { %1966 = vmatprep.mubr.msk.f32.mxu1 %vm2146_vm1, %v2145_v22 }
 0x627   :  { %v1225_v38 = vpop.permute.xlu1 %1224  ;;  %v1247_v39 = vpop.permute.xlu0 %1246 }
 0x628   :  { %v1261_v40 = vsel %vm371_vm4, %v1258_v34, %v1247_v39  ;;  %v1255_v41 = vsel %vm275_vm2, %v2603_v6, %v1225_v38 }
 0x629   :  { %1967 = vmatmul.mubr.msk.f32.gmra.mxu1 %vm48_vm0, %v1261_v40 }
 0x62a   :  { %1969 = vmatprep.mubr.msk.f32.mxu1 %vm2146_vm1, %v2145_v22 }
 0x62b   :  { %v1237_v33 = vpop.permute.xlu0 %1236  ;;  %v1249_v42 = vpop.permute.xlu1 %1248 }
 0x62c   :  { %v1259_v43 = vsel %vm1256_vm7, %v1255_v41, %v1237_v33 }
 0x62d   :  { %v1262_v44 = vsel %vm371_vm4, %v1259_v43, %v1249_v42  ;;  %v1564_v43 = vld [vmem:[%s2795_s11 + $0x78] sm:$0xff] }
 0x62e   :  { %1970 = vmatmul.mubr.msk.f32.gmra.mxu1 %vm48_vm0, %v1262_v44  ;;  %v1563_v44 = vld [vmem:[%s2795_s11 + $0x70] sm:$0xff] }
 0x62f   :  { %2021 = vmatprep.mubr.msk.f32.mxu1 %vm2146_vm1, %v2145_v22  ;;  %1990 = vmatpush3.msra.mxu1 %v1564_v43 }
 0x630   :  { %1991 = vmatprep.subr.mxu1 %v2145_v22 }
 0x631   :  { %1992 = vmatpush3.msra.mxu1 %v1563_v44 }
 0x632   :  { %1993 = vmatprep.subr.mxu1 %v2145_v22 }
 0x6e5   :  { %v1349_v47 = vpop.f32.mrf.mxu1 }
 0x6e6   :  { %v1350_v48 = vadd.f32 %v1716_v46, %v1349_v47  ;;  %v1561_v47 = vld [vmem:[%s2795_s11 + $0x60] sm:$0xff] }
 0x6e7   :  { %v1965_v49 = vpop.f32.mrf.mxu1 }
 0x6e8   :  { %v2649_v51 = vadd.f32 %v2120_v45, %v1350_v48  ;;  %v1560_v48 = vld [vmem:[%s2795_s11 + $0x58] sm:$0xff]  ;;  %v1559_v49 = vld [vmem:[%s2795_s11 + $0x50] sm:$0xff]  ;;  %v1558_v45 = vld [vmem:[%s2795_s11 + $0x48] sm:$0xff] }
 0x6e9   :  { %v1354_v52 = vpop.f32.mrf.mxu1 }
 0x6ea   :  { %v1355_v54 = vadd.f32 %v1716_v46, %v1354_v52  ;;  %v1366_v50 = vsel %vm48_vm0, %v2649_v51, 0.0  ;;  %v1557_v52 = vld [vmem:[%s2795_s11 + $0x40] sm:$0xff] }
 0x6eb   :  { %1367 = vadd.xlane.f32.xlu0 %v1366_v50  ;;  %v1968_v58 = vpop.f32.mrf.mxu1  ;;  %v1555_v50 = vld [vmem:[%s2795_s11 + $0x30] sm:$0xff] }
 0x6ec   :  { %v2656_v60 = vadd.f32 %v2121_v55, %v1355_v54  ;;  %v1556_v54 = vld [vmem:[%s2795_s11 + $0x38] sm:$0xff]  ;;  %v1554_v58 = vld [vmem:[%s2795_s11 + $0x28] sm:$0xff]  ;;  %v1553_v55 = vld [vmem:[%s2795_s11 + $0x20] sm:$0xff] }
 0x6ee   :  { %v1359_v59 = vpop.f32.mrf.mxu1  ;;  %v1369_v61 = vsel %vm48_vm0, %v2656_v60, 0.0 }
 0x6ef   :  { %v1360_v62 = vadd.f32 %v1716_v46, %v1359_v59  ;;  %1370 = vadd.xlane.f32.xlu1 %v1369_v61  ;;  %v1562_v46 = vld [vmem:[%s2795_s11 + $0x68] sm:$0xff]  ;;  %v1552_v59 = vld [vmem:[%s2795_s11 + $0x18] sm:$0xff]  ;;  %v1551_v61 = vld [vmem:[%s2795_s11 + $0x10] sm:$0xff] }
 0x6f0   :  { %v1971_v63 = vpop.f32.mrf.mxu1  ;;  %1994 = vmatpush3.msra.mxu1 %v1562_v46 }
 0x6f1   :  { %v2663_v2 = vadd.f32 %v2122_v1, %v1360_v62  ;;  %1995 = vmatprep.subr.mxu1 %v2145_v22  ;;  %v1550_v62 = vld [vmem:[%s2795_s11 + $0x8] sm:$0xff]  ;;  %v1549_v63 = vld [vmem:[%s2795_s11] sm:$0xff] }
 0x6f2   :  { %1996 = vmatpush3.msra.mxu1 %v1561_v47  ;;  %v1722_v1 = vld [vmem:[%s2794_s10] ss:$0 sm:$0xff] }
 0x6f3   :  { %v1372_v3 = vsel %vm48_vm0, %v2663_v2, 0.0  ;;  %1997 = vmatprep.subr.mxu1 %v2145_v22 }
 0x6f4   :  { %1373 = vadd.xlane.f32.xlu0 %v1372_v3  ;;  %1998 = vmatpush3.msra.mxu1 %v1560_v48 }
 0x6f5   :  { %1999 = vmatprep.subr.mxu1 %v2145_v22 }
 0x6f6   :  { %2000 = vmatpush3.msra.mxu1 %v1559_v49 }
 0x6f7   :  { %2001 = vmatprep.subr.mxu1 %v2145_v22 }
 0x6f8   :  { %2002 = vmatpush3.msra.mxu1 %v1558_v45 }
 0x6f9   :  { %2003 = vmatprep.subr.mxu1 %v2145_v22 }
 0x6fa   :  { %2004 = vmatpush3.msra.mxu1 %v1557_v52 }
 0x6fb   :  { %2005 = vmatprep.subr.mxu1 %v2145_v22 }
 0x6fc   :  { %2006 = vmatpush3.msra.mxu1 %v1556_v54 }
 0x6fd   :  { %2007 = vmatprep.subr.mxu1 %v2145_v22 }
 0x6fe   :  { %2008 = vmatpush3.msra.mxu1 %v1555_v50 }
 0x6ff   :  { %2009 = vmatprep.subr.mxu1 %v2145_v22 }
 0x700   :  { %2010 = vmatpush3.msra.mxu1 %v1554_v58 }
 0x701   :  { %2011 = vmatprep.subr.mxu1 %v2145_v22 }
 0x702   :  { %2012 = vmatpush3.msra.mxu1 %v1553_v55 }
 0x703   :  { %2013 = vmatprep.subr.mxu1 %v2145_v22 }
 0x704   :  { %2014 = vmatpush3.msra.mxu1 %v1552_v59 }
 0x705   :  { %2015 = vmatprep.subr.mxu1 %v2145_v22 }
 0x706   :  { %2016 = vmatpush3.msra.mxu1 %v1551_v61 }
 0x707   :  { %2017 = vmatprep.subr.mxu1 %v2145_v22 }
 0x708   :  { %2018 = vmatpush3.msra.mxu1 %v1550_v62 }
 0x709   :  { %2019 = vmatprep.subr.mxu1 %v2145_v22 }
 0x70a   :  { %2020 = vmatpush3.msra.mxu1 %v1549_v63 }
 0x774   :  { %v1368_v4 = vpop.xlane.xlu0 %1367 }
 0x775   :  { %v1375_v5 = vmul.f32 0.03125, %v1368_v4 }
 0x777   :  { %v1378_v6 = vsub.f32 %v2649_v51, %v1375_v5 }
 0x778   :  { %v1371_v7 = vpop.xlane.xlu1 %1370 }
 0x779   :  { %v1376_v8 = vmul.f32 0.03125, %v1371_v7  ;;  %v1381_v9 = vmul.f32 %v1378_v6, %v1378_v6 }
 0x77b   :  { %v1379_v10 = vsub.f32 %v2656_v60, %v1376_v8  ;;  %v1384_v11 = vsel %vm48_vm0, %v1381_v9, 0.0 }
 0x77c   :  { %1385 = vadd.xlane.f32.xlu0 %v1384_v11 }
 0x77d   :  { %v1374_v12 = vpop.xlane.xlu0 %1373  ;;  %v1382_v13 = vmul.f32 %v1379_v10, %v1379_v10 }
 0x77e   :  { %v1377_v14 = vmul.f32 0.03125, %v1374_v12 }
 0x77f   :  { %v1387_v16 = vsel %vm48_vm0, %v1382_v13, 0.0 }
 0x780   :  { %v1380_v17 = vsub.f32 %v2663_v2, %v1377_v14  ;;  %1388 = vadd.xlane.f32.xlu0 %v1387_v16 }
 0x782   :  { %v1383_v18 = vmul.f32 %v1380_v17, %v1380_v17 }
 0x784   :  { %v1390_v20 = vsel %vm48_vm0, %v1383_v18, 0.0 }
 0x785   :  { %1391 = vadd.xlane.f32.xlu1 %v1390_v20 }
 0x805   :  { %v1386_v0 = vpop.xlane.xlu0 %1385 }
 0x806   :  { %v1393_v15 = vmul.f32 0.03125, %v1386_v0 }
 0x808   :  { %v1396_v25 = vadd.f32 1e-05, %v1393_v15 }
 0x809   :  { %v1389_v26 = vpop.xlane.xlu0 %1388 }
 0x80a   :  { %2102 = vrsqrt.f32 %v1396_v25  ;;  %v1394_v56 = vmul.f32 0.03125, %v1389_v26 }
 0x80c   :  { %v1397_v27 = vadd.f32 1e-05, %v1394_v56 }
 0x80e   :  { %2104 = vrsqrt.f32 %v1397_v27  ;;  %v1392_v53 = vpop.xlane.xlu1 %1391 }
 0x80f   :  { %v1395_v28 = vmul.f32 0.03125, %v1392_v53 }
 0x811   :  { %v1398_v19 = vadd.f32 1e-05, %v1395_v28  ;;  %v1729_v28 = vld [vmem:[%s2796_s12] ss:$0 sm:$0xff]  ;;  %s2123_s12 = scalar_lea.vmem %s1664_s27, 384 }
 0x812   :  { %p2124_p0 = scmp.ne.s32.totalorder %s1664_s27, %s2123_s12  ;;  %p2129_p2 = scmp.lt.s32.totalorder %s2123_s12, %s2123_s12 }
 0x813   :  { %2106 = vrsqrt.f32 %v1398_v19 }
 0x814   :  { %p2130_p3 = por %p2129_p2, %p2128_p1 }
 0x816   :  { %p2131_p4 = pnand %p2130_p3, %p2124_p0 }
 0x817   :  { %v2103_v29 = vpop.eup %2102 }
 0x818   :  { %v1402_v32 = vmul.f32 %v2103_v29, %v1378_v6 }
 0x81a   :  { %v1412_v35 = vmul.f32 %v1720_v31, %v1402_v32 }
 0x81b   :  { %v2105_v36 = vpop.eup %2104 }
 0x81c   :  { %v1422_v37 = vadd.f32 %v1721_v30, %v1412_v35  ;;  %v1403_v34 = vmul.f32 %v2105_v36, %v1379_v10 }
 0x81e   :  { %1981 = vmatmul.mubr.msk.f32.vlgmr.msra.gmra.mxu0 %vm48_vm0, %v1422_v37  ;;  %v1413_v38 = vmul.f32 %v1720_v31, %v1403_v34 }
 0x81f   :  { %1983 = vmatprep.mubr.msk.f32.mxu0 %vm2146_vm1, %v2145_v22 }
 0x820   :  { %v2107_v39 = vpop.eup %2106  ;;  %v1423_v40 = vadd.f32 %v1721_v30, %v1413_v38 }
 0x821   :  { %v1404_v41 = vmul.f32 %v2107_v39, %v1380_v17 }
 0x822   :  { %1984 = vmatmul.mubr.msk.f32.gmra.mxu0 %vm48_vm0, %v1423_v40 }
 0x823   :  { %1986 = vmatprep.mubr.msk.f32.mxu0 %vm2146_vm1, %v2145_v22  ;;  %v1414_v33 = vmul.f32 %v1720_v31, %v1404_v41 }
 0x825   :  { %v1424_v42 = vadd.f32 %v1721_v30, %v1414_v33 }
 0x827   :  { %1987 = vmatmul.mubr.msk.f32.gmra.mxu0 %vm48_vm0, %v1424_v42 }
 0x8de   :  { %v1511_v3 = vpop.f32.mrf.mxu0 }
 0x8df   :  { %v1512_v4 = vadd.f32 %v1722_v1, %v1511_v3 }
 0x8e0   :  { %v1982_v5 = vpop.f32.mrf.mxu0 }
 0x8e1   :  { %v1726_v6 = vmul.f32 -1.702, %v1512_v4 }
 0x8e2   :  { %v1516_v7 = vpop.f32.mrf.mxu0 }
 0x8e3   :  { %v1531_v8 = vmul.f32 1.442695, %v1726_v6  ;;  %v1517_v9 = vadd.f32 %v1722_v1, %v1516_v7 }
 0x8e4   :  { %v1985_v10 = vpop.f32.mrf.mxu0 }
 0x8e5   :  { %2108 = vpow2.f32 %v1531_v8  ;;  %v1727_v11 = vmul.f32 -1.702, %v1517_v9 }
 0x8e7   :  { %v1533_v12 = vmul.f32 1.442695, %v1727_v11  ;;  %v1521_v13 = vpop.f32.mrf.mxu0 }
 0x8e8   :  { %v1522_v14 = vadd.f32 %v1722_v1, %v1521_v13 }
 0x8e9   :  { %2110 = vpow2.f32 %v1533_v12  ;;  %v1988_v16 = vpop.f32.mrf.mxu0 }
 0x8ea   :  { %v1728_v17 = vmul.f32 -1.702, %v1522_v14 }
 0x8ec   :  { %v1535_v18 = vmul.f32 1.442695, %v1728_v17 }
 0x8ee   :  { %2112 = vpow2.f32 %v1535_v18 }
 0x8f2   :  { %v2109_v20 = vpop.eup %2108 }
 0x8f3   :  { %v1537_v21 = vadd.f32 1.0, %v2109_v20 }
 0x8f5   :  { %2114 = vrcp.f32 %v1537_v21 }
 0x8f6   :  { %v2111_v57 = vpop.eup %2110 }
 0x8f7   :  { %v1538_v23 = vadd.f32 1.0, %v2111_v57 }
 0x8f9   :  { %2116 = vrcp.f32 %v1538_v23 }
 0x8fb   :  { %v2113_v24 = vpop.eup %2112 }
 0x8fc   :  { %v1539_v0 = vadd.f32 1.0, %v2113_v24 }
 0x8fe   :  { %2118 = vrcp.f32 %v1539_v0 }
 0x902   :  { %v2115_v15 = vpop.eup %2114 }
 0x903   :  { %v1546_v25 = vmul.f32 %v2115_v15, %v1512_v4 }
 0x905   :  { %2022 = vmatmul.mubr.f32.vlgmr.msra.gmra.mxu1 %v1546_v25 }
 0x906   :  { %v2117_v26 = vpop.eup %2116  ;;  %2024 = vmatprep.mubr.msk.f32.mxu1 %vm2146_vm1, %v2145_v22 }
 0x907   :  { %v1547_v56 = vmul.f32 %v2117_v26, %v1517_v9 }
 0x909   :  { %2025 = vmatmul.mubr.f32.gmra.mxu1 %v1547_v56 }
 0x90a   :  { %2027 = vmatprep.mubr.msk.f32.mxu1 %vm2146_vm1, %v2145_v22 }
 0x90b   :  { %v2119_v27 = vpop.eup %2118 }
 0x90c   :  { %v1548_v53 = vmul.f32 %v2119_v27, %v1522_v14 }
 0x90e   :  { %2028 = vmatmul.mubr.f32.gmra.mxu1 %v1548_v53 }
 0x9c5   :  { %v1638_v19 = vpop.f32.mrf.mxu1 }
 0x9c6   :  { %v1639_v29 = vadd.f32 %v1729_v28, %v1638_v19 }
 0x9c7   :  { %v2023_v31 = vpop.f32.mrf.mxu1 }
 0x9c8   :  { %v1652_v32 = vadd.f32 %v1639_v29, %v2649_v51 }
 0x9c9   :  { %v1643_v30 = vpop.f32.mrf.mxu1 }
 0x9ca   :  { %1655 = vst.msk [vmem:[#allocation2] sm:$0xff] %vm48_vm0, %v1652_v32  ;;  %v1644_v35 = vadd.f32 %v1729_v28, %v1643_v30 }
 0x9cb   :  { %v2026_v36 = vpop.f32.mrf.mxu1 }
 0x9cc   :  { %v1653_v37 = vadd.f32 %v1644_v35, %v2656_v60 }
 0x9ce   :  { %1656 = vst.msk [vmem:[#allocation2 + $0x8] sm:$0xff] %vm48_vm0, %v1653_v37  ;;  %v1648_v22 = vpop.f32.mrf.mxu1 }
 0x9cf   :  { %v1649_v34 = vadd.f32 %v1729_v28, %v1648_v22 }
 0x9d0   :  { %v2029_v38 = vpop.f32.mrf.mxu1 }
 0x9d1   :  { %v1654_v39 = vadd.f32 %v1649_v34, %v2663_v2 }
 0x9d3   :  { %1657 = vst.msk [vmem:[#allocation2 + $0x10] sm:$0xff] %vm48_vm0, %v1654_v39 }
 0x9d4   :  { %2134 = shalt.err (!%p2131_p4)
}
 0x9d5   :  { %s2162_s28 = smov 128  }
 0x9d6   :  { %1669 = dma.vmem_to_hbm [thread:$0]  %s1664_s27, 384, %s2797_s13, [#allocation3], %s2162_s28, %s2162_s28, %s2158_s20  }
 0x9d7   :  { %2143 = dma.done.wait [#allocation3], 384  }
 0x9d8   :  { %2144 = vsyncadd [#allocation3], 4294966912 }
 0x9d9   :  { %1673 = vsyncpa [#allocation3], 1 }

</bundles_post_ra>
